<compile_context>
chip_gen: v7x
topology: tpu7x:2x2x1
jax: 0.10.0
libtpu: 0.0.40
codegen_flags: <defaults>
</compile_context>

<pallas_src>
import jax
import jax.numpy as jnp
import numpy as np
from jax.experimental import pallas as pl
from jax.experimental.pallas import tpu as pltpu

# ----- static module configuration (Capsule.__init__ args) -----
B = 2            # batch_size
IN_NUM = 8       # number of input capsules
IN_DIM = 16      # input_dim
OUT_NUM = 4      # output_num
OUT_DIM = 8      # output_dim
ITERS = 3        # routing iterations
LEAKY = True     # leaky routing
BN_EPS = 1e-5    # nn.BatchNorm1d default eps


def capsule_kernel(x_ref, w_ref, p_ref, act_ref, logits_ref):
    # x_ref     : (B*IN, IN_DIM)   input capsules, (batch, input capsule) flattened
    # w_ref     : (IN_DIM, ON*OD)  transformation weights
    # p_ref     : (3, ON*OD)       row 0: biases, row 1: BN gamma (repeated over OD),
    #                              row 2: BN beta (repeated over OD)
    # act_ref   : (B, ON*OD)       squashed output activations
    # logits_ref: (B*IN, ON)       routing probabilities of the last iteration
    b = act_ref.shape[0]
    bi, onod = x_ref.shape[0], w_ref.shape[1]
    in_num = bi // b
    on = logits_ref.shape[1]
    od = onod // on
    inv_od = 1.0 / float(od)
    inv_cnt = 1.0 / float(b * od)

    bias = p_ref[0:1, :]
    gamma = p_ref[1:2, :]
    beta = p_ref[2:3, :]

    # votes[(b,i),(o,d)] = (x @ W)[(b,i),(o,d)] + bias[(o,d)]  -- the only MXU op.
    votes = jnp.dot(x_ref[...], w_ref[...], preferred_element_type=jnp.float32) + bias
    votes_b = [votes[k * in_num:(k + 1) * in_num, :] for k in range(b)]  # (IN, ON*OD)

    # Per-output-capsule lane masks and one-hot rows (loop invariant, built once).
    lane = jax.lax.broadcasted_iota(jnp.int32, (1, onod), 1)
    masks = [jnp.where((lane >= o * od) & (lane < (o + 1) * od),
                       1.0, 0.0).astype(jnp.float32) for o in range(on)]   # (1, ON*OD)
    cap = jax.lax.broadcasted_iota(jnp.int32, (1, on), 1)
    units = [jnp.where(cap == o, 1.0, 0.0).astype(jnp.float32)
             for o in range(on)]                                            # (1, ON)

    def seg_sum_bcast(v):
        # Per row: sum the OD lanes of each output capsule and broadcast the sum back
        # over those lanes (exact f32, XLU lane reductions + VPU mul/add).
        out = None
        for o in range(on):
            s = jnp.sum(v * masks[o], axis=-1, keepdims=True)
            term = s * masks[o]
            out = term if out is None else out + term
        return out

    def seg_compact(v):
        # (rows, ON*OD) with OD-replicated values -> (rows, ON)
        out = None
        for o in range(on):
            s = jnp.sum(v * masks[o], axis=-1, keepdims=True) * inv_od
            term = s * units[o]
            out = term if out is None else out + term
        return out

    # Routing state, per batch element.  Logits are kept replicated over the OD lanes
    # of each output capsule so the softmax over output capsules is a lane reduction.
    logits_e = [jnp.zeros((in_num, onod), jnp.float32) for _ in range(b)]
    route = logits_e
    acts = [jnp.zeros((1, onod), jnp.float32) for _ in range(b)]

    for _ in range(ITERS):
        route = []
        pres = []
        for k in range(b):
            # (leaky) softmax over output capsules: lane reduce + EUP exp.
            m = jnp.max(logits_e[k], axis=-1, keepdims=True)
            if LEAKY:
                m = jnp.maximum(m, 0.0)
            e = jnp.exp(logits_e[k] - m)
            den = jnp.sum(e, axis=-1, keepdims=True) * inv_od  # correct OD replication
            if LEAKY:
                den = den + jnp.exp(-m)
            r = e / den                                        # (IN, ON*OD), replicated
            route.append(r)
            # preactive[b,(o,d)] = sum_i r[b,i,o] * votes[(b,i),(o,d)] + bias
            pres.append(jnp.sum(r * votes_b[k], axis=0, keepdims=True) + bias)  # (1, ON*OD)

        # BatchNorm1d(output_num): training-mode batch stats over (batch, output_dim),
        # one-pass mean / E[x^2], each with a single segmented reduce.
        colsum = pres[0]
        colsq = pres[0] * pres[0]
        for k in range(1, b):
            colsum = colsum + pres[k]
            colsq = colsq + pres[k] * pres[k]
        mean = seg_sum_bcast(colsum) * inv_cnt
        ex2 = seg_sum_bcast(colsq) * inv_cnt
        var = ex2 - mean * mean
        scale = jax.lax.rsqrt(var + BN_EPS) * gamma            # (1, ON*OD)

        acts = []
        logits_e = []
        for k in range(b):
            pre_bn = (pres[k] - mean) * scale + beta           # (1, ON*OD)
            # squash along output_dim
            sn = seg_sum_bcast(pre_bn * pre_bn)                # (1, ON*OD)
            # TODO(synk): like the PyTorch module, no epsilon under rsqrt(sn); sn == 0 -> NaN.
            a = pre_bn * (sn / (1.0 + sn)) * jax.lax.rsqrt(sn)
            acts.append(a)
            # agreement: dist[(b,i),o] = sum_d act[b,(o,d)] * votes[(b,i),(o,d)],
            # kept OD-replicated so it feeds the next softmax directly.
            logits_e.append(seg_sum_bcast(a * votes_b[k]))     # (IN, ON*OD)

    for k in range(b):
        act_ref[k:k + 1, :] = acts[k]
        logits_ref[k * in_num:(k + 1) * in_num, :] = seg_compact(route[k])


def capsule_forward(x, weight, biases, bn_gamma, bn_beta):
    b, in_num, in_dim = x.shape
    on, od = biases.shape[1], biases.shape[2]

    x2d = x.reshape(b * in_num, in_dim)                       # contiguous -> free
    # Parameter prep (tiny, parameter-sized): stack bias / gamma / beta as (3, ON*OD).
    params = jnp.concatenate(
        [biases.reshape(1, on * od),
         jnp.broadcast_to(bn_gamma.reshape(on, 1), (on, od)).reshape(1, on * od),
         jnp.broadcast_to(bn_beta.reshape(on, 1), (on, od)).reshape(1, on * od)],
        axis=0).astype(jnp.float32)

    act2, logits2 = pl.pallas_call(
        capsule_kernel,
        out_shape=(jax.ShapeDtypeStruct((b, on * od), jnp.float32),
                   jax.ShapeDtypeStruct((b * in_num, on), jnp.float32)),
        in_specs=[pl.BlockSpec(memory_space=pltpu.MemorySpace.VMEM)] * 3,
        out_specs=(pl.BlockSpec(memory_space=pltpu.MemorySpace.VMEM),
                   pl.BlockSpec(memory_space=pltpu.MemorySpace.VMEM)),
    )(x2d, weight, params)

    activation = act2.reshape(b, on, od)                      # contiguous (bitcast) reshapes
    logits = logits2.reshape(b, in_num, on)
    return activation, logits


def capsule_reference(x, weight, biases, bn_gamma, bn_beta):
    """Pure-JAX mirror of the PyTorch forward (for correctness check)."""
    b, in_num, in_dim = x.shape
    on, od = biases.shape[1], biases.shape[2]
    votes = (x.reshape(b * in_num, in_dim) @ weight).reshape(b, in_num, on, od) + biases
    logits = jnp.zeros((b, in_num, on), jnp.float32)
    r = logits
    act = None
    for _ in range(ITERS):
        if LEAKY:
            m = jnp.maximum(jnp.max(logits, axis=2, keepdims=True), 0.0)
            e = jnp.exp(logits - m)
            r = e / (jnp.exp(-m) + jnp.sum(e, axis=2, keepdims=True))
        else:
            r = jax.nn.softmax(logits, axis=2)
        pre = jnp.sum(r[..., None] * votes, axis=1) + biases
        mean = jnp.mean(pre, axis=(0, 2), keepdims=True)
        var = jnp.mean((pre - mean) ** 2, axis=(0, 2), keepdims=True)
        pre = (pre - mean) / jnp.sqrt(var + BN_EPS) * bn_gamma.reshape(1, on, 1) \
              + bn_beta.reshape(1, on, 1)
        sn = jnp.sum(pre ** 2, axis=-1, keepdims=True)
        act = (sn / (1.0 + sn)) * pre / jnp.sqrt(sn)
        logits = jnp.einsum('bod,biod->bio', act, votes)
    return act, r


if __name__ == "__main__":
    key = jax.random.PRNGKey(0)
    k_x, k_w, k_b = jax.random.split(key, 3)

    # Deterministic parameter init (shapes from Capsule.__init__: torch.randn)
    weight = jax.random.normal(k_w, (IN_DIM, OUT_NUM * OUT_DIM), jnp.float32)
    biases = jax.random.normal(k_b, (1, OUT_NUM, OUT_DIM), jnp.float32)
    bn_gamma = jnp.ones((OUT_NUM,), jnp.float32)    # BatchNorm1d default affine init
    bn_beta = jnp.zeros((OUT_NUM,), jnp.float32)

    # Input capsules: [batch_size, input_num, input_dim]
    x = jax.random.normal(k_x, (B, IN_NUM, IN_DIM), jnp.float32)

    activation, logits = jax.jit(capsule_forward)(x, weight, biases, bn_gamma, bn_beta)
    jax.block_until_ready((activation, logits))

    act_ref, logits_ref = capsule_reference(x, weight, biases, bn_gamma, bn_beta)
    np.testing.assert_allclose(np.asarray(activation), np.asarray(act_ref),
                               rtol=2e-4, atol=1e-5)
    np.testing.assert_allclose(np.asarray(logits), np.asarray(logits_ref),
                               rtol=2e-4, atol=1e-5)
    assert activation.shape == (B, OUT_NUM, OUT_DIM)
    assert logits.shape == (B, IN_NUM, OUT_NUM)

    print("KERNEL_OK")
</pallas_src>

<mosaic_0001>
module attributes {stable_mosaic.version = 11 : i64} {
  func.func @capsule_kernel(%arg0: memref<16x16xf32, #tpu.memory_space<vmem>>, %arg1: memref<16x32xf32, #tpu.memory_space<vmem>>, %arg2: memref<3x32xf32, #tpu.memory_space<vmem>>, %arg3: memref<2x32xf32, #tpu.memory_space<vmem>>, %arg4: memref<16x4xf32, #tpu.memory_space<vmem>>) attributes {dimension_semantics = [], scalar_prefetch = 0 : i64, scratch_operands = 0 : i64, tpu.core_type = #tpu.core_type<tc>} {
    %c0 = arith.constant 0 : index
    %c0_0 = arith.constant 0 : index
    %0 = vector.load %arg2[%c0, %c0_0] : memref<3x32xf32, #tpu.memory_space<vmem>>, vector<1x32xf32>
    %c1 = arith.constant 1 : index
    %c0_1 = arith.constant 0 : index
    %1 = vector.load %arg2[%c1, %c0_1] : memref<3x32xf32, #tpu.memory_space<vmem>>, vector<1x32xf32>
    %c2 = arith.constant 2 : index
    %c0_2 = arith.constant 0 : index
    %2 = vector.load %arg2[%c2, %c0_2] : memref<3x32xf32, #tpu.memory_space<vmem>>, vector<1x32xf32>
    %c0_3 = arith.constant 0 : index
    %c0_4 = arith.constant 0 : index
    %3 = vector.load %arg0[%c0_3, %c0_4] : memref<16x16xf32, #tpu.memory_space<vmem>>, vector<16x16xf32>
    %c0_5 = arith.constant 0 : index
    %c0_6 = arith.constant 0 : index
    %4 = vector.load %arg1[%c0_5, %c0_6] : memref<16x32xf32, #tpu.memory_space<vmem>>, vector<16x32xf32>
    %cst = arith.constant dense<0.000000e+00> : vector<16x32xf32>
    %5 = tpu.matmul %3, %4, %cst {dimension_numbers = #tpu.dot_dimension_numbers<[1], [0], [0], [1], [0, 0, 1, 1], [], []>} : vector<16x16xf32>, vector<16x32xf32>, vector<16x32xf32> -> vector<16x32xf32>
    %6 = vector.broadcast %0 : vector<1x32xf32> to vector<16x32xf32>
    %7 = arith.addf %5, %6 : vector<16x32xf32>
    %8 = vector.extract_strided_slice %7 {offsets = [0, 0], sizes = [8, 32], strides = [1, 1]} : vector<16x32xf32> to vector<8x32xf32>
    %9 = vector.extract_strided_slice %7 {offsets = [8, 0], sizes = [8, 32], strides = [1, 1]} : vector<16x32xf32> to vector<8x32xf32>
    %10 = tpu.iota {dimensions = array<i32: 1>} : vector<1x32xi32>
    %c0_i32 = arith.constant 0 : i32
    %11 = vector.broadcast %c0_i32 : i32 to vector<1x32xi32>
    %12 = arith.cmpi sge, %10, %11 : vector<1x32xi32>
    %c8_i32 = arith.constant 8 : i32
    %13 = vector.broadcast %c8_i32 : i32 to vector<1x32xi32>
    %14 = arith.cmpi slt, %10, %13 : vector<1x32xi32>
    %15 = arith.andi %12, %14 : vector<1x32xi1>
    %cst_7 = arith.constant 1.000000e+00 : f32
    %cst_8 = arith.constant 0.000000e+00 : f32
    %16 = vector.broadcast %cst_7 : f32 to vector<1x32xf32>
    %17 = vector.broadcast %cst_8 : f32 to vector<1x32xf32>
    %18 = arith.select %15, %16, %17 : vector<1x32xi1>, vector<1x32xf32>
    %c8_i32_9 = arith.constant 8 : i32
    %19 = vector.broadcast %c8_i32_9 : i32 to vector<1x32xi32>
    %20 = arith.cmpi sge, %10, %19 : vector<1x32xi32>
    %c16_i32 = arith.constant 16 : i32
    %21 = vector.broadcast %c16_i32 : i32 to vector<1x32xi32>
    %22 = arith.cmpi slt, %10, %21 : vector<1x32xi32>
    %23 = arith.andi %20, %22 : vector<1x32xi1>
    %cst_10 = arith.constant 1.000000e+00 : f32
    %cst_11 = arith.constant 0.000000e+00 : f32
    %24 = vector.broadcast %cst_10 : f32 to vector<1x32xf32>
    %25 = vector.broadcast %cst_11 : f32 to vector<1x32xf32>
    %26 = arith.select %23, %24, %25 : vector<1x32xi1>, vector<1x32xf32>
    %c16_i32_12 = arith.constant 16 : i32
    %27 = vector.broadcast %c16_i32_12 : i32 to vector<1x32xi32>
    %28 = arith.cmpi sge, %10, %27 : vector<1x32xi32>
    %c24_i32 = arith.constant 24 : i32
    %29 = vector.broadcast %c24_i32 : i32 to vector<1x32xi32>
    %30 = arith.cmpi slt, %10, %29 : vector<1x32xi32>
    %31 = arith.andi %28, %30 : vector<1x32xi1>
    %cst_13 = arith.constant 1.000000e+00 : f32
    %cst_14 = arith.constant 0.000000e+00 : f32
    %32 = vector.broadcast %cst_13 : f32 to vector<1x32xf32>
    %33 = vector.broadcast %cst_14 : f32 to vector<1x32xf32>
    %34 = arith.select %31, %32, %33 : vector<1x32xi1>, vector<1x32xf32>
    %c24_i32_15 = arith.constant 24 : i32
    %35 = vector.broadcast %c24_i32_15 : i32 to vector<1x32xi32>
    %36 = arith.cmpi sge, %10, %35 : vector<1x32xi32>
    %c32_i32 = arith.constant 32 : i32
    %37 = vector.broadcast %c32_i32 : i32 to vector<1x32xi32>
    %38 = arith.cmpi slt, %10, %37 : vector<1x32xi32>
    %39 = arith.andi %36, %38 : vector<1x32xi1>
    %cst_16 = arith.constant 1.000000e+00 : f32
    %cst_17 = arith.constant 0.000000e+00 : f32
    %40 = vector.broadcast %cst_16 : f32 to vector<1x32xf32>
    %41 = vector.broadcast %cst_17 : f32 to vector<1x32xf32>
    %42 = arith.select %39, %40, %41 : vector<1x32xi1>, vector<1x32xf32>
    %43 = tpu.iota {dimensions = array<i32: 1>} : vector<1x4xi32>
    %c0_i32_18 = arith.constant 0 : i32
    %44 = vector.broadcast %c0_i32_18 : i32 to vector<1x4xi32>
    %45 = arith.cmpi eq, %43, %44 : vector<1x4xi32>
    %cst_19 = arith.constant 1.000000e+00 : f32
    %cst_20 = arith.constant 0.000000e+00 : f32
    %46 = vector.broadcast %cst_19 : f32 to vector<1x4xf32>
    %47 = vector.broadcast %cst_20 : f32 to vector<1x4xf32>
    %48 = arith.select %45, %46, %47 : vector<1x4xi1>, vector<1x4xf32>
    %c1_i32 = arith.constant 1 : i32
    %49 = vector.broadcast %c1_i32 : i32 to vector<1x4xi32>
    %50 = arith.cmpi eq, %43, %49 : vector<1x4xi32>
    %cst_21 = arith.constant 1.000000e+00 : f32
    %cst_22 = arith.constant 0.000000e+00 : f32
    %51 = vector.broadcast %cst_21 : f32 to vector<1x4xf32>
    %52 = vector.broadcast %cst_22 : f32 to vector<1x4xf32>
    %53 = arith.select %50, %51, %52 : vector<1x4xi1>, vector<1x4xf32>
    %c2_i32 = arith.constant 2 : i32
    %54 = vector.broadcast %c2_i32 : i32 to vector<1x4xi32>
    %55 = arith.cmpi eq, %43, %54 : vector<1x4xi32>
    %cst_23 = arith.constant 1.000000e+00 : f32
    %cst_24 = arith.constant 0.000000e+00 : f32
    %56 = vector.broadcast %cst_23 : f32 to vector<1x4xf32>
    %57 = vector.broadcast %cst_24 : f32 to vector<1x4xf32>
    %58 = arith.select %55, %56, %57 : vector<1x4xi1>, vector<1x4xf32>
    %c3_i32 = arith.constant 3 : i32
    %59 = vector.broadcast %c3_i32 : i32 to vector<1x4xi32>
    %60 = arith.cmpi eq, %43, %59 : vector<1x4xi32>
    %cst_25 = arith.constant 1.000000e+00 : f32
    %cst_26 = arith.constant 0.000000e+00 : f32
    %61 = vector.broadcast %cst_25 : f32 to vector<1x4xf32>
    %62 = vector.broadcast %cst_26 : f32 to vector<1x4xf32>
    %63 = arith.select %60, %61, %62 : vector<1x4xi1>, vector<1x4xf32>
    %cst_27 = arith.constant 0.000000e+00 : f32
    %64 = vector.broadcast %cst_27 : f32 to vector<8x32xf32>
    %cst_28 = arith.constant 0.000000e+00 : f32
    %65 = vector.broadcast %cst_28 : f32 to vector<8x32xf32>
    %cst_29 = arith.constant dense<0xFF800000> : vector<8xf32>
    %66 = vector.multi_reduction <maximumf>, %64, %cst_29 [1] : vector<8x32xf32> to vector<8xf32>
    %67 = vector.shape_cast %66 : vector<8xf32> to vector<8x1xf32>
    %cst_30 = arith.constant 0.000000e+00 : f32
    %68 = vector.broadcast %cst_30 : f32 to vector<8x1xf32>
    %69 = arith.maximumf %67, %68 : vector<8x1xf32>
    %70 = vector.broadcast %69 : vector<8x1xf32> to vector<8x32xf32>
    %71 = arith.subf %64, %70 : vector<8x32xf32>
    %72 = math.exp %71 : vector<8x32xf32>
    %cst_31 = arith.constant dense<0.000000e+00> : vector<8xf32>
    %73 = vector.multi_reduction <add>, %72, %cst_31 [1] : vector<8x32xf32> to vector<8xf32>
    %74 = vector.shape_cast %73 : vector<8xf32> to vector<8x1xf32>
    %cst_32 = arith.constant 1.250000e-01 : f32
    %75 = vector.broadcast %cst_32 : f32 to vector<8x1xf32>
    %76 = arith.mulf %74, %75 : vector<8x1xf32>
    %cst_33 = arith.constant 0.000000e+00 : f32
    %77 = vector.broadcast %cst_33 : f32 to vector<8x1xf32>
    %78 = arith.subf %77, %69 : vector<8x1xf32>
    %79 = math.exp %78 : vector<8x1xf32>
    %80 = arith.addf %76, %79 : vector<8x1xf32>
    %81 = vector.broadcast %80 : vector<8x1xf32> to vector<8x32xf32>
    %82 = arith.divf %72, %81 : vector<8x32xf32>
    %83 = arith.mulf %82, %8 : vector<8x32xf32>
    %cst_34 = arith.constant dense<0.000000e+00> : vector<32xf32>
    %84 = vector.multi_reduction <add>, %83, %cst_34 [0] : vector<8x32xf32> to vector<32xf32>
    %85 = vector.shape_cast %84 : vector<32xf32> to vector<1x32xf32>
    %86 = arith.addf %85, %0 : vector<1x32xf32>
    %cst_35 = arith.constant dense<0xFF800000> : vector<8xf32>
    %87 = vector.multi_reduction <maximumf>, %65, %cst_35 [1] : vector<8x32xf32> to vector<8xf32>
    %88 = vector.shape_cast %87 : vector<8xf32> to vector<8x1xf32>
    %cst_36 = arith.constant 0.000000e+00 : f32
    %89 = vector.broadcast %cst_36 : f32 to vector<8x1xf32>
    %90 = arith.maximumf %88, %89 : vector<8x1xf32>
    %91 = vector.broadcast %90 : vector<8x1xf32> to vector<8x32xf32>
    %92 = arith.subf %65, %91 : vector<8x32xf32>
    %93 = math.exp %92 : vector<8x32xf32>
    %cst_37 = arith.constant dense<0.000000e+00> : vector<8xf32>
    %94 = vector.multi_reduction <add>, %93, %cst_37 [1] : vector<8x32xf32> to vector<8xf32>
    %95 = vector.shape_cast %94 : vector<8xf32> to vector<8x1xf32>
    %cst_38 = arith.constant 1.250000e-01 : f32
    %96 = vector.broadcast %cst_38 : f32 to vector<8x1xf32>
    %97 = arith.mulf %95, %96 : vector<8x1xf32>
    %cst_39 = arith.constant 0.000000e+00 : f32
    %98 = vector.broadcast %cst_39 : f32 to vector<8x1xf32>
    %99 = arith.subf %98, %90 : vector<8x1xf32>
    %100 = math.exp %99 : vector<8x1xf32>
    %101 = arith.addf %97, %100 : vector<8x1xf32>
    %102 = vector.broadcast %101 : vector<8x1xf32> to vector<8x32xf32>
    %103 = arith.divf %93, %102 : vector<8x32xf32>
    %104 = arith.mulf %103, %9 : vector<8x32xf32>
    %cst_40 = arith.constant dense<0.000000e+00> : vector<32xf32>
    %105 = vector.multi_reduction <add>, %104, %cst_40 [0] : vector<8x32xf32> to vector<32xf32>
    %106 = vector.shape_cast %105 : vector<32xf32> to vector<1x32xf32>
    %107 = arith.addf %106, %0 : vector<1x32xf32>
    %108 = arith.mulf %86, %86 : vector<1x32xf32>
    %109 = arith.addf %86, %107 : vector<1x32xf32>
    %110 = arith.mulf %107, %107 : vector<1x32xf32>
    %111 = arith.addf %108, %110 : vector<1x32xf32>
    %112 = arith.mulf %109, %18 : vector<1x32xf32>
    %cst_41 = arith.constant dense<0.000000e+00> : vector<1xf32>
    %113 = vector.multi_reduction <add>, %112, %cst_41 [1] : vector<1x32xf32> to vector<1xf32>
    %114 = vector.shape_cast %113 : vector<1xf32> to vector<1x1xf32>
    %115 = vector.broadcast %114 : vector<1x1xf32> to vector<1x32xf32>
    %116 = arith.mulf %115, %18 : vector<1x32xf32>
    %117 = arith.mulf %109, %26 : vector<1x32xf32>
    %cst_42 = arith.constant dense<0.000000e+00> : vector<1xf32>
    %118 = vector.multi_reduction <add>, %117, %cst_42 [1] : vector<1x32xf32> to vector<1xf32>
    %119 = vector.shape_cast %118 : vector<1xf32> to vector<1x1xf32>
    %120 = vector.broadcast %119 : vector<1x1xf32> to vector<1x32xf32>
    %121 = arith.mulf %120, %26 : vector<1x32xf32>
    %122 = arith.addf %116, %121 : vector<1x32xf32>
    %123 = arith.mulf %109, %34 : vector<1x32xf32>
    %cst_43 = arith.constant dense<0.000000e+00> : vector<1xf32>
    %124 = vector.multi_reduction <add>, %123, %cst_43 [1] : vector<1x32xf32> to vector<1xf32>
    %125 = vector.shape_cast %124 : vector<1xf32> to vector<1x1xf32>
    %126 = vector.broadcast %125 : vector<1x1xf32> to vector<1x32xf32>
    %127 = arith.mulf %126, %34 : vector<1x32xf32>
    %128 = arith.addf %122, %127 : vector<1x32xf32>
    %129 = arith.mulf %109, %42 : vector<1x32xf32>
    %cst_44 = arith.constant dense<0.000000e+00> : vector<1xf32>
    %130 = vector.multi_reduction <add>, %129, %cst_44 [1] : vector<1x32xf32> to vector<1xf32>
    %131 = vector.shape_cast %130 : vector<1xf32> to vector<1x1xf32>
    %132 = vector.broadcast %131 : vector<1x1xf32> to vector<1x32xf32>
    %133 = arith.mulf %132, %42 : vector<1x32xf32>
    %134 = arith.addf %128, %133 : vector<1x32xf32>
    %cst_45 = arith.constant 6.250000e-02 : f32
    %135 = vector.broadcast %cst_45 : f32 to vector<1x32xf32>
    %136 = arith.mulf %134, %135 : vector<1x32xf32>
    %137 = arith.mulf %111, %18 : vector<1x32xf32>
    %cst_46 = arith.constant dense<0.000000e+00> : vector<1xf32>
    %138 = vector.multi_reduction <add>, %137, %cst_46 [1] : vector<1x32xf32> to vector<1xf32>
    %139 = vector.shape_cast %138 : vector<1xf32> to vector<1x1xf32>
    %140 = vector.broadcast %139 : vector<1x1xf32> to vector<1x32xf32>
    %141 = arith.mulf %140, %18 : vector<1x32xf32>
    %142 = arith.mulf %111, %26 : vector<1x32xf32>
    %cst_47 = arith.constant dense<0.000000e+00> : vector<1xf32>
    %143 = vector.multi_reduction <add>, %142, %cst_47 [1] : vector<1x32xf32> to vector<1xf32>
    %144 = vector.shape_cast %143 : vector<1xf32> to vector<1x1xf32>
    %145 = vector.broadcast %144 : vector<1x1xf32> to vector<1x32xf32>
    %146 = arith.mulf %145, %26 : vector<1x32xf32>
    %147 = arith.addf %141, %146 : vector<1x32xf32>
    %148 = arith.mulf %111, %34 : vector<1x32xf32>
    %cst_48 = arith.constant dense<0.000000e+00> : vector<1xf32>
    %149 = vector.multi_reduction <add>, %148, %cst_48 [1] : vector<1x32xf32> to vector<1xf32>
    %150 = vector.shape_cast %149 : vector<1xf32> to vector<1x1xf32>
    %151 = vector.broadcast %150 : vector<1x1xf32> to vector<1x32xf32>
    %152 = arith.mulf %151, %34 : vector<1x32xf32>
    %153 = arith.addf %147, %152 : vector<1x32xf32>
    %154 = arith.mulf %111, %42 : vector<1x32xf32>
    %cst_49 = arith.constant dense<0.000000e+00> : vector<1xf32>
    %155 = vector.multi_reduction <add>, %154, %cst_49 [1] : vector<1x32xf32> to vector<1xf32>
    %156 = vector.shape_cast %155 : vector<1xf32> to vector<1x1xf32>
    %157 = vector.broadcast %156 : vector<1x1xf32> to vector<1x32xf32>
    %158 = arith.mulf %157, %42 : vector<1x32xf32>
    %159 = arith.addf %153, %158 : vector<1x32xf32>
    %cst_50 = arith.constant 6.250000e-02 : f32
    %160 = vector.broadcast %cst_50 : f32 to vector<1x32xf32>
    %161 = arith.mulf %159, %160 : vector<1x32xf32>
    %162 = arith.mulf %136, %136 : vector<1x32xf32>
    %163 = arith.subf %161, %162 : vector<1x32xf32>
    %cst_51 = arith.constant 9.99999974E-6 : f32
    %164 = vector.broadcast %cst_51 : f32 to vector<1x32xf32>
    %165 = arith.addf %163, %164 : vector<1x32xf32>
    %166 = math.rsqrt %165 : vector<1x32xf32>
    %167 = arith.mulf %166, %1 : vector<1x32xf32>
    %168 = arith.subf %86, %136 : vector<1x32xf32>
    %169 = arith.mulf %168, %167 : vector<1x32xf32>
    %170 = arith.addf %169, %2 : vector<1x32xf32>
    %171 = arith.mulf %170, %170 : vector<1x32xf32>
    %172 = arith.mulf %171, %18 : vector<1x32xf32>
    %cst_52 = arith.constant dense<0.000000e+00> : vector<1xf32>
    %173 = vector.multi_reduction <add>, %172, %cst_52 [1] : vector<1x32xf32> to vector<1xf32>
    %174 = vector.shape_cast %173 : vector<1xf32> to vector<1x1xf32>
    %175 = vector.broadcast %174 : vector<1x1xf32> to vector<1x32xf32>
    %176 = arith.mulf %175, %18 : vector<1x32xf32>
    %177 = arith.mulf %171, %26 : vector<1x32xf32>
    %cst_53 = arith.constant dense<0.000000e+00> : vector<1xf32>
    %178 = vector.multi_reduction <add>, %177, %cst_53 [1] : vector<1x32xf32> to vector<1xf32>
    %179 = vector.shape_cast %178 : vector<1xf32> to vector<1x1xf32>
    %180 = vector.broadcast %179 : vector<1x1xf32> to vector<1x32xf32>
    %181 = arith.mulf %180, %26 : vector<1x32xf32>
    %182 = arith.addf %176, %181 : vector<1x32xf32>
    %183 = arith.mulf %171, %34 : vector<1x32xf32>
    %cst_54 = arith.constant dense<0.000000e+00> : vector<1xf32>
    %184 = vector.multi_reduction <add>, %183, %cst_54 [1] : vector<1x32xf32> to vector<1xf32>
    %185 = vector.shape_cast %184 : vector<1xf32> to vector<1x1xf32>
    %186 = vector.broadcast %185 : vector<1x1xf32> to vector<1x32xf32>
    %187 = arith.mulf %186, %34 : vector<1x32xf32>
    %188 = arith.addf %182, %187 : vector<1x32xf32>
    %189 = arith.mulf %171, %42 : vector<1x32xf32>
    %cst_55 = arith.constant dense<0.000000e+00> : vector<1xf32>
    %190 = vector.multi_reduction <add>, %189, %cst_55 [1] : vector<1x32xf32> to vector<1xf32>
    %191 = vector.shape_cast %190 : vector<1xf32> to vector<1x1xf32>
    %192 = vector.broadcast %191 : vector<1x1xf32> to vector<1x32xf32>
    %193 = arith.mulf %192, %42 : vector<1x32xf32>
    %194 = arith.addf %188, %193 : vector<1x32xf32>
    %cst_56 = arith.constant 1.000000e+00 : f32
    %195 = vector.broadcast %cst_56 : f32 to vector<1x32xf32>
    %196 = arith.addf %195, %194 : vector<1x32xf32>
    %197 = arith.divf %194, %196 : vector<1x32xf32>
    %198 = arith.mulf %170, %197 : vector<1x32xf32>
    %199 = math.rsqrt %194 : vector<1x32xf32>
    %200 = arith.mulf %198, %199 : vector<1x32xf32>
    %201 = vector.broadcast %200 : vector<1x32xf32> to vector<8x32xf32>
    %202 = arith.mulf %201, %8 : vector<8x32xf32>
    %203 = vector.broadcast %18 : vector<1x32xf32> to vector<8x32xf32>
    %204 = arith.mulf %202, %203 : vector<8x32xf32>
    %cst_57 = arith.constant dense<0.000000e+00> : vector<8xf32>
    %205 = vector.multi_reduction <add>, %204, %cst_57 [1] : vector<8x32xf32> to vector<8xf32>
    %206 = vector.shape_cast %205 : vector<8xf32> to vector<8x1xf32>
    %207 = vector.broadcast %206 : vector<8x1xf32> to vector<8x32xf32>
    %208 = vector.broadcast %18 : vector<1x32xf32> to vector<8x32xf32>
    %209 = arith.mulf %207, %208 : vector<8x32xf32>
    %210 = vector.broadcast %26 : vector<1x32xf32> to vector<8x32xf32>
    %211 = arith.mulf %202, %210 : vector<8x32xf32>
    %cst_58 = arith.constant dense<0.000000e+00> : vector<8xf32>
    %212 = vector.multi_reduction <add>, %211, %cst_58 [1] : vector<8x32xf32> to vector<8xf32>
    %213 = vector.shape_cast %212 : vector<8xf32> to vector<8x1xf32>
    %214 = vector.broadcast %213 : vector<8x1xf32> to vector<8x32xf32>
    %215 = vector.broadcast %26 : vector<1x32xf32> to vector<8x32xf32>
    %216 = arith.mulf %214, %215 : vector<8x32xf32>
    %217 = arith.addf %209, %216 : vector<8x32xf32>
    %218 = vector.broadcast %34 : vector<1x32xf32> to vector<8x32xf32>
    %219 = arith.mulf %202, %218 : vector<8x32xf32>
    %cst_59 = arith.constant dense<0.000000e+00> : vector<8xf32>
    %220 = vector.multi_reduction <add>, %219, %cst_59 [1] : vector<8x32xf32> to vector<8xf32>
    %221 = vector.shape_cast %220 : vector<8xf32> to vector<8x1xf32>
    %222 = vector.broadcast %221 : vector<8x1xf32> to vector<8x32xf32>
    %223 = vector.broadcast %34 : vector<1x32xf32> to vector<8x32xf32>
    %224 = arith.mulf %222, %223 : vector<8x32xf32>
    %225 = arith.addf %217, %224 : vector<8x32xf32>
    %226 = vector.broadcast %42 : vector<1x32xf32> to vector<8x32xf32>
    %227 = arith.mulf %202, %226 : vector<8x32xf32>
    %cst_60 = arith.constant dense<0.000000e+00> : vector<8xf32>
    %228 = vector.multi_reduction <add>, %227, %cst_60 [1] : vector<8x32xf32> to vector<8xf32>
    %229 = vector.shape_cast %228 : vector<8xf32> to vector<8x1xf32>
    %230 = vector.broadcast %229 : vector<8x1xf32> to vector<8x32xf32>
    %231 = vector.broadcast %42 : vector<1x32xf32> to vector<8x32xf32>
    %232 = arith.mulf %230, %231 : vector<8x32xf32>
    %233 = arith.addf %225, %232 : vector<8x32xf32>
    %234 = arith.subf %107, %136 : vector<1x32xf32>
    %235 = arith.mulf %234, %167 : vector<1x32xf32>
    %236 = arith.addf %235, %2 : vector<1x32xf32>
    %237 = arith.mulf %236, %236 : vector<1x32xf32>
    %238 = arith.mulf %237, %18 : vector<1x32xf32>
    %cst_61 = arith.constant dense<0.000000e+00> : vector<1xf32>
    %239 = vector.multi_reduction <add>, %238, %cst_61 [1] : vector<1x32xf32> to vector<1xf32>
    %240 = vector.shape_cast %239 : vector<1xf32> to vector<1x1xf32>
    %241 = vector.broadcast %240 : vector<1x1xf32> to vector<1x32xf32>
    %242 = arith.mulf %241, %18 : vector<1x32xf32>
    %243 = arith.mulf %237, %26 : vector<1x32xf32>
    %cst_62 = arith.constant dense<0.000000e+00> : vector<1xf32>
    %244 = vector.multi_reduction <add>, %243, %cst_62 [1] : vector<1x32xf32> to vector<1xf32>
    %245 = vector.shape_cast %244 : vector<1xf32> to vector<1x1xf32>
    %246 = vector.broadcast %245 : vector<1x1xf32> to vector<1x32xf32>
    %247 = arith.mulf %246, %26 : vector<1x32xf32>
    %248 = arith.addf %242, %247 : vector<1x32xf32>
    %249 = arith.mulf %237, %34 : vector<1x32xf32>
    %cst_63 = arith.constant dense<0.000000e+00> : vector<1xf32>
    %250 = vector.multi_reduction <add>, %249, %cst_63 [1] : vector<1x32xf32> to vector<1xf32>
    %251 = vector.shape_cast %250 : vector<1xf32> to vector<1x1xf32>
    %252 = vector.broadcast %251 : vector<1x1xf32> to vector<1x32xf32>
    %253 = arith.mulf %252, %34 : vector<1x32xf32>
    %254 = arith.addf %248, %253 : vector<1x32xf32>
    %255 = arith.mulf %237, %42 : vector<1x32xf32>
    %cst_64 = arith.constant dense<0.000000e+00> : vector<1xf32>
    %256 = vector.multi_reduction <add>, %255, %cst_64 [1] : vector<1x32xf32> to vector<1xf32>
    %257 = vector.shape_cast %256 : vector<1xf32> to vector<1x1xf32>
    %258 = vector.broadcast %257 : vector<1x1xf32> to vector<1x32xf32>
    %259 = arith.mulf %258, %42 : vector<1x32xf32>
    %260 = arith.addf %254, %259 : vector<1x32xf32>
    %cst_65 = arith.constant 1.000000e+00 : f32
    %261 = vector.broadcast %cst_65 : f32 to vector<1x32xf32>
    %262 = arith.addf %261, %260 : vector<1x32xf32>
    %263 = arith.divf %260, %262 : vector<1x32xf32>
    %264 = arith.mulf %236, %263 : vector<1x32xf32>
    %265 = math.rsqrt %260 : vector<1x32xf32>
    %266 = arith.mulf %264, %265 : vector<1x32xf32>
    %267 = vector.broadcast %266 : vector<1x32xf32> to vector<8x32xf32>
    %268 = arith.mulf %267, %9 : vector<8x32xf32>
    %269 = vector.broadcast %18 : vector<1x32xf32> to vector<8x32xf32>
    %270 = arith.mulf %268, %269 : vector<8x32xf32>
    %cst_66 = arith.constant dense<0.000000e+00> : vector<8xf32>
    %271 = vector.multi_reduction <add>, %270, %cst_66 [1] : vector<8x32xf32> to vector<8xf32>
    %272 = vector.shape_cast %271 : vector<8xf32> to vector<8x1xf32>
    %273 = vector.broadcast %272 : vector<8x1xf32> to vector<8x32xf32>
    %274 = vector.broadcast %18 : vector<1x32xf32> to vector<8x32xf32>
    %275 = arith.mulf %273, %274 : vector<8x32xf32>
    %276 = vector.broadcast %26 : vector<1x32xf32> to vector<8x32xf32>
    %277 = arith.mulf %268, %276 : vector<8x32xf32>
    %cst_67 = arith.constant dense<0.000000e+00> : vector<8xf32>
    %278 = vector.multi_reduction <add>, %277, %cst_67 [1] : vector<8x32xf32> to vector<8xf32>
    %279 = vector.shape_cast %278 : vector<8xf32> to vector<8x1xf32>
    %280 = vector.broadcast %279 : vector<8x1xf32> to vector<8x32xf32>
    %281 = vector.broadcast %26 : vector<1x32xf32> to vector<8x32xf32>
    %282 = arith.mulf %280, %281 : vector<8x32xf32>
    %283 = arith.addf %275, %282 : vector<8x32xf32>
    %284 = vector.broadcast %34 : vector<1x32xf32> to vector<8x32xf32>
    %285 = arith.mulf %268, %284 : vector<8x32xf32>
    %cst_68 = arith.constant dense<0.000000e+00> : vector<8xf32>
    %286 = vector.multi_reduction <add>, %285, %cst_68 [1] : vector<8x32xf32> to vector<8xf32>
    %287 = vector.shape_cast %286 : vector<8xf32> to vector<8x1xf32>
    %288 = vector.broadcast %287 : vector<8x1xf32> to vector<8x32xf32>
    %289 = vector.broadcast %34 : vector<1x32xf32> to vector<8x32xf32>
    %290 = arith.mulf %288, %289 : vector<8x32xf32>
    %291 = arith.addf %283, %290 : vector<8x32xf32>
    %292 = vector.broadcast %42 : vector<1x32xf32> to vector<8x32xf32>
    %293 = arith.mulf %268, %292 : vector<8x32xf32>
    %cst_69 = arith.constant dense<0.000000e+00> : vector<8xf32>
    %294 = vector.multi_reduction <add>, %293, %cst_69 [1] : vector<8x32xf32> to vector<8xf32>
    %295 = vector.shape_cast %294 : vector<8xf32> to vector<8x1xf32>
    %296 = vector.broadcast %295 : vector<8x1xf32> to vector<8x32xf32>
    %297 = vector.broadcast %42 : vector<1x32xf32> to vector<8x32xf32>
    %298 = arith.mulf %296, %297 : vector<8x32xf32>
    %299 = arith.addf %291, %298 : vector<8x32xf32>
    %cst_70 = arith.constant dense<0xFF800000> : vector<8xf32>
    %300 = vector.multi_reduction <maximumf>, %233, %cst_70 [1] : vector<8x32xf32> to vector<8xf32>
    %301 = vector.shape_cast %300 : vector<8xf32> to vector<8x1xf32>
    %cst_71 = arith.constant 0.000000e+00 : f32
    %302 = vector.broadcast %cst_71 : f32 to vector<8x1xf32>
    %303 = arith.maximumf %301, %302 : vector<8x1xf32>
    %304 = vector.broadcast %303 : vector<8x1xf32> to vector<8x32xf32>
    %305 = arith.subf %233, %304 : vector<8x32xf32>
    %306 = math.exp %305 : vector<8x32xf32>
    %cst_72 = arith.constant dense<0.000000e+00> : vector<8xf32>
    %307 = vector.multi_reduction <add>, %306, %cst_72 [1] : vector<8x32xf32> to vector<8xf32>
    %308 = vector.shape_cast %307 : vector<8xf32> to vector<8x1xf32>
    %cst_73 = arith.constant 1.250000e-01 : f32
    %309 = vector.broadcast %cst_73 : f32 to vector<8x1xf32>
    %310 = arith.mulf %308, %309 : vector<8x1xf32>
    %cst_74 = arith.constant 0.000000e+00 : f32
    %311 = vector.broadcast %cst_74 : f32 to vector<8x1xf32>
    %312 = arith.subf %311, %303 : vector<8x1xf32>
    %313 = math.exp %312 : vector<8x1xf32>
    %314 = arith.addf %310, %313 : vector<8x1xf32>
    %315 = vector.broadcast %314 : vector<8x1xf32> to vector<8x32xf32>
    %316 = arith.divf %306, %315 : vector<8x32xf32>
    %317 = arith.mulf %316, %8 : vector<8x32xf32>
    %cst_75 = arith.constant dense<0.000000e+00> : vector<32xf32>
    %318 = vector.multi_reduction <add>, %317, %cst_75 [0] : vector<8x32xf32> to vector<32xf32>
    %319 = vector.shape_cast %318 : vector<32xf32> to vector<1x32xf32>
    %320 = arith.addf %319, %0 : vector<1x32xf32>
    %cst_76 = arith.constant dense<0xFF800000> : vector<8xf32>
    %321 = vector.multi_reduction <maximumf>, %299, %cst_76 [1] : vector<8x32xf32> to vector<8xf32>
    %322 = vector.shape_cast %321 : vector<8xf32> to vector<8x1xf32>
    %cst_77 = arith.constant 0.000000e+00 : f32
    %323 = vector.broadcast %cst_77 : f32 to vector<8x1xf32>
    %324 = arith.maximumf %322, %323 : vector<8x1xf32>
    %325 = vector.broadcast %324 : vector<8x1xf32> to vector<8x32xf32>
    %326 = arith.subf %299, %325 : vector<8x32xf32>
    %327 = math.exp %326 : vector<8x32xf32>
    %cst_78 = arith.constant dense<0.000000e+00> : vector<8xf32>
    %328 = vector.multi_reduction <add>, %327, %cst_78 [1] : vector<8x32xf32> to vector<8xf32>
    %329 = vector.shape_cast %328 : vector<8xf32> to vector<8x1xf32>
    %cst_79 = arith.constant 1.250000e-01 : f32
    %330 = vector.broadcast %cst_79 : f32 to vector<8x1xf32>
    %331 = arith.mulf %329, %330 : vector<8x1xf32>
    %cst_80 = arith.constant 0.000000e+00 : f32
    %332 = vector.broadcast %cst_80 : f32 to vector<8x1xf32>
    %333 = arith.subf %332, %324 : vector<8x1xf32>
    %334 = math.exp %333 : vector<8x1xf32>
    %335 = arith.addf %331, %334 : vector<8x1xf32>
    %336 = vector.broadcast %335 : vector<8x1xf32> to vector<8x32xf32>
    %337 = arith.divf %327, %336 : vector<8x32xf32>
    %338 = arith.mulf %337, %9 : vector<8x32xf32>
    %cst_81 = arith.constant dense<0.000000e+00> : vector<32xf32>
    %339 = vector.multi_reduction <add>, %338, %cst_81 [0] : vector<8x32xf32> to vector<32xf32>
    %340 = vector.shape_cast %339 : vector<32xf32> to vector<1x32xf32>
    %341 = arith.addf %340, %0 : vector<1x32xf32>
    %342 = arith.mulf %320, %320 : vector<1x32xf32>
    %343 = arith.addf %320, %341 : vector<1x32xf32>
    %344 = arith.mulf %341, %341 : vector<1x32xf32>
    %345 = arith.addf %342, %344 : vector<1x32xf32>
    %346 = arith.mulf %343, %18 : vector<1x32xf32>
    %cst_82 = arith.constant dense<0.000000e+00> : vector<1xf32>
    %347 = vector.multi_reduction <add>, %346, %cst_82 [1] : vector<1x32xf32> to vector<1xf32>
    %348 = vector.shape_cast %347 : vector<1xf32> to vector<1x1xf32>
    %349 = vector.broadcast %348 : vector<1x1xf32> to vector<1x32xf32>
    %350 = arith.mulf %349, %18 : vector<1x32xf32>
    %351 = arith.mulf %343, %26 : vector<1x32xf32>
    %cst_83 = arith.constant dense<0.000000e+00> : vector<1xf32>
    %352 = vector.multi_reduction <add>, %351, %cst_83 [1] : vector<1x32xf32> to vector<1xf32>
    %353 = vector.shape_cast %352 : vector<1xf32> to vector<1x1xf32>
    %354 = vector.broadcast %353 : vector<1x1xf32> to vector<1x32xf32>
    %355 = arith.mulf %354, %26 : vector<1x32xf32>
    %356 = arith.addf %350, %355 : vector<1x32xf32>
    %357 = arith.mulf %343, %34 : vector<1x32xf32>
    %cst_84 = arith.constant dense<0.000000e+00> : vector<1xf32>
    %358 = vector.multi_reduction <add>, %357, %cst_84 [1] : vector<1x32xf32> to vector<1xf32>
    %359 = vector.shape_cast %358 : vector<1xf32> to vector<1x1xf32>
    %360 = vector.broadcast %359 : vector<1x1xf32> to vector<1x32xf32>
    %361 = arith.mulf %360, %34 : vector<1x32xf32>
    %362 = arith.addf %356, %361 : vector<1x32xf32>
    %363 = arith.mulf %343, %42 : vector<1x32xf32>
    %cst_85 = arith.constant dense<0.000000e+00> : vector<1xf32>
    %364 = vector.multi_reduction <add>, %363, %cst_85 [1] : vector<1x32xf32> to vector<1xf32>
    %365 = vector.shape_cast %364 : vector<1xf32> to vector<1x1xf32>
    %366 = vector.broadcast %365 : vector<1x1xf32> to vector<1x32xf32>
    %367 = arith.mulf %366, %42 : vector<1x32xf32>
    %368 = arith.addf %362, %367 : vector<1x32xf32>
    %cst_86 = arith.constant 6.250000e-02 : f32
    %369 = vector.broadcast %cst_86 : f32 to vector<1x32xf32>
    %370 = arith.mulf %368, %369 : vector<1x32xf32>
    %371 = arith.mulf %345, %18 : vector<1x32xf32>
    %cst_87 = arith.constant dense<0.000000e+00> : vector<1xf32>
    %372 = vector.multi_reduction <add>, %371, %cst_87 [1] : vector<1x32xf32> to vector<1xf32>
    %373 = vector.shape_cast %372 : vector<1xf32> to vector<1x1xf32>
    %374 = vector.broadcast %373 : vector<1x1xf32> to vector<1x32xf32>
    %375 = arith.mulf %374, %18 : vector<1x32xf32>
    %376 = arith.mulf %345, %26 : vector<1x32xf32>
    %cst_88 = arith.constant dense<0.000000e+00> : vector<1xf32>
    %377 = vector.multi_reduction <add>, %376, %cst_88 [1] : vector<1x32xf32> to vector<1xf32>
    %378 = vector.shape_cast %377 : vector<1xf32> to vector<1x1xf32>
    %379 = vector.broadcast %378 : vector<1x1xf32> to vector<1x32xf32>
    %380 = arith.mulf %379, %26 : vector<1x32xf32>
    %381 = arith.addf %375, %380 : vector<1x32xf32>
    %382 = arith.mulf %345, %34 : vector<1x32xf32>
    %cst_89 = arith.constant dense<0.000000e+00> : vector<1xf32>
    %383 = vector.multi_reduction <add>, %382, %cst_89 [1] : vector<1x32xf32> to vector<1xf32>
    %384 = vector.shape_cast %383 : vector<1xf32> to vector<1x1xf32>
    %385 = vector.broadcast %384 : vector<1x1xf32> to vector<1x32xf32>
    %386 = arith.mulf %385, %34 : vector<1x32xf32>
    %387 = arith.addf %381, %386 : vector<1x32xf32>
    %388 = arith.mulf %345, %42 : vector<1x32xf32>
    %cst_90 = arith.constant dense<0.000000e+00> : vector<1xf32>
    %389 = vector.multi_reduction <add>, %388, %cst_90 [1] : vector<1x32xf32> to vector<1xf32>
    %390 = vector.shape_cast %389 : vector<1xf32> to vector<1x1xf32>
    %391 = vector.broadcast %390 : vector<1x1xf32> to vector<1x32xf32>
    %392 = arith.mulf %391, %42 : vector<1x32xf32>
    %393 = arith.addf %387, %392 : vector<1x32xf32>
    %cst_91 = arith.constant 6.250000e-02 : f32
    %394 = vector.broadcast %cst_91 : f32 to vector<1x32xf32>
    %395 = arith.mulf %393, %394 : vector<1x32xf32>
    %396 = arith.mulf %370, %370 : vector<1x32xf32>
    %397 = arith.subf %395, %396 : vector<1x32xf32>
    %cst_92 = arith.constant 9.99999974E-6 : f32
    %398 = vector.broadcast %cst_92 : f32 to vector<1x32xf32>
    %399 = arith.addf %397, %398 : vector<1x32xf32>
    %400 = math.rsqrt %399 : vector<1x32xf32>
    %401 = arith.mulf %400, %1 : vector<1x32xf32>
    %402 = arith.subf %320, %370 : vector<1x32xf32>
    %403 = arith.mulf %402, %401 : vector<1x32xf32>
    %404 = arith.addf %403, %2 : vector<1x32xf32>
    %405 = arith.mulf %404, %404 : vector<1x32xf32>
    %406 = arith.mulf %405, %18 : vector<1x32xf32>
    %cst_93 = arith.constant dense<0.000000e+00> : vector<1xf32>
    %407 = vector.multi_reduction <add>, %406, %cst_93 [1] : vector<1x32xf32> to vector<1xf32>
    %408 = vector.shape_cast %407 : vector<1xf32> to vector<1x1xf32>
    %409 = vector.broadcast %408 : vector<1x1xf32> to vector<1x32xf32>
    %410 = arith.mulf %409, %18 : vector<1x32xf32>
    %411 = arith.mulf %405, %26 : vector<1x32xf32>
    %cst_94 = arith.constant dense<0.000000e+00> : vector<1xf32>
    %412 = vector.multi_reduction <add>, %411, %cst_94 [1] : vector<1x32xf32> to vector<1xf32>
    %413 = vector.shape_cast %412 : vector<1xf32> to vector<1x1xf32>
    %414 = vector.broadcast %413 : vector<1x1xf32> to vector<1x32xf32>
    %415 = arith.mulf %414, %26 : vector<1x32xf32>
    %416 = arith.addf %410, %415 : vector<1x32xf32>
    %417 = arith.mulf %405, %34 : vector<1x32xf32>
    %cst_95 = arith.constant dense<0.000000e+00> : vector<1xf32>
    %418 = vector.multi_reduction <add>, %417, %cst_95 [1] : vector<1x32xf32> to vector<1xf32>
    %419 = vector.shape_cast %418 : vector<1xf32> to vector<1x1xf32>
    %420 = vector.broadcast %419 : vector<1x1xf32> to vector<1x32xf32>
    %421 = arith.mulf %420, %34 : vector<1x32xf32>
    %422 = arith.addf %416, %421 : vector<1x32xf32>
    %423 = arith.mulf %405, %42 : vector<1x32xf32>
    %cst_96 = arith.constant dense<0.000000e+00> : vector<1xf32>
    %424 = vector.multi_reduction <add>, %423, %cst_96 [1] : vector<1x32xf32> to vector<1xf32>
    %425 = vector.shape_cast %424 : vector<1xf32> to vector<1x1xf32>
    %426 = vector.broadcast %425 : vector<1x1xf32> to vector<1x32xf32>
    %427 = arith.mulf %426, %42 : vector<1x32xf32>
    %428 = arith.addf %422, %427 : vector<1x32xf32>
    %cst_97 = arith.constant 1.000000e+00 : f32
    %429 = vector.broadcast %cst_97 : f32 to vector<1x32xf32>
    %430 = arith.addf %429, %428 : vector<1x32xf32>
    %431 = arith.divf %428, %430 : vector<1x32xf32>
    %432 = arith.mulf %404, %431 : vector<1x32xf32>
    %433 = math.rsqrt %428 : vector<1x32xf32>
    %434 = arith.mulf %432, %433 : vector<1x32xf32>
    %435 = vector.broadcast %434 : vector<1x32xf32> to vector<8x32xf32>
    %436 = arith.mulf %435, %8 : vector<8x32xf32>
    %437 = vector.broadcast %18 : vector<1x32xf32> to vector<8x32xf32>
    %438 = arith.mulf %436, %437 : vector<8x32xf32>
    %cst_98 = arith.constant dense<0.000000e+00> : vector<8xf32>
    %439 = vector.multi_reduction <add>, %438, %cst_98 [1] : vector<8x32xf32> to vector<8xf32>
    %440 = vector.shape_cast %439 : vector<8xf32> to vector<8x1xf32>
    %441 = vector.broadcast %440 : vector<8x1xf32> to vector<8x32xf32>
    %442 = vector.broadcast %18 : vector<1x32xf32> to vector<8x32xf32>
    %443 = arith.mulf %441, %442 : vector<8x32xf32>
    %444 = vector.broadcast %26 : vector<1x32xf32> to vector<8x32xf32>
    %445 = arith.mulf %436, %444 : vector<8x32xf32>
    %cst_99 = arith.constant dense<0.000000e+00> : vector<8xf32>
    %446 = vector.multi_reduction <add>, %445, %cst_99 [1] : vector<8x32xf32> to vector<8xf32>
    %447 = vector.shape_cast %446 : vector<8xf32> to vector<8x1xf32>
    %448 = vector.broadcast %447 : vector<8x1xf32> to vector<8x32xf32>
    %449 = vector.broadcast %26 : vector<1x32xf32> to vector<8x32xf32>
    %450 = arith.mulf %448, %449 : vector<8x32xf32>
    %451 = arith.addf %443, %450 : vector<8x32xf32>
    %452 = vector.broadcast %34 : vector<1x32xf32> to vector<8x32xf32>
    %453 = arith.mulf %436, %452 : vector<8x32xf32>
    %cst_100 = arith.constant dense<0.000000e+00> : vector<8xf32>
    %454 = vector.multi_reduction <add>, %453, %cst_100 [1] : vector<8x32xf32> to vector<8xf32>
    %455 = vector.shape_cast %454 : vector<8xf32> to vector<8x1xf32>
    %456 = vector.broadcast %455 : vector<8x1xf32> to vector<8x32xf32>
    %457 = vector.broadcast %34 : vector<1x32xf32> to vector<8x32xf32>
    %458 = arith.mulf %456, %457 : vector<8x32xf32>
    %459 = arith.addf %451, %458 : vector<8x32xf32>
    %460 = vector.broadcast %42 : vector<1x32xf32> to vector<8x32xf32>
    %461 = arith.mulf %436, %460 : vector<8x32xf32>
    %cst_101 = arith.constant dense<0.000000e+00> : vector<8xf32>
    %462 = vector.multi_reduction <add>, %461, %cst_101 [1] : vector<8x32xf32> to vector<8xf32>
    %463 = vector.shape_cast %462 : vector<8xf32> to vector<8x1xf32>
    %464 = vector.broadcast %463 : vector<8x1xf32> to vector<8x32xf32>
    %465 = vector.broadcast %42 : vector<1x32xf32> to vector<8x32xf32>
    %466 = arith.mulf %464, %465 : vector<8x32xf32>
    %467 = arith.addf %459, %466 : vector<8x32xf32>
    %468 = arith.subf %341, %370 : vector<1x32xf32>
    %469 = arith.mulf %468, %401 : vector<1x32xf32>
    %470 = arith.addf %469, %2 : vector<1x32xf32>
    %471 = arith.mulf %470, %470 : vector<1x32xf32>
    %472 = arith.mulf %471, %18 : vector<1x32xf32>
    %cst_102 = arith.constant dense<0.000000e+00> : vector<1xf32>
    %473 = vector.multi_reduction <add>, %472, %cst_102 [1] : vector<1x32xf32> to vector<1xf32>
    %474 = vector.shape_cast %473 : vector<1xf32> to vector<1x1xf32>
    %475 = vector.broadcast %474 : vector<1x1xf32> to vector<1x32xf32>
    %476 = arith.mulf %475, %18 : vector<1x32xf32>
    %477 = arith.mulf %471, %26 : vector<1x32xf32>
    %cst_103 = arith.constant dense<0.000000e+00> : vector<1xf32>
    %478 = vector.multi_reduction <add>, %477, %cst_103 [1] : vector<1x32xf32> to vector<1xf32>
    %479 = vector.shape_cast %478 : vector<1xf32> to vector<1x1xf32>
    %480 = vector.broadcast %479 : vector<1x1xf32> to vector<1x32xf32>
    %481 = arith.mulf %480, %26 : vector<1x32xf32>
    %482 = arith.addf %476, %481 : vector<1x32xf32>
    %483 = arith.mulf %471, %34 : vector<1x32xf32>
    %cst_104 = arith.constant dense<0.000000e+00> : vector<1xf32>
    %484 = vector.multi_reduction <add>, %483, %cst_104 [1] : vector<1x32xf32> to vector<1xf32>
    %485 = vector.shape_cast %484 : vector<1xf32> to vector<1x1xf32>
    %486 = vector.broadcast %485 : vector<1x1xf32> to vector<1x32xf32>
    %487 = arith.mulf %486, %34 : vector<1x32xf32>
    %488 = arith.addf %482, %487 : vector<1x32xf32>
    %489 = arith.mulf %471, %42 : vector<1x32xf32>
    %cst_105 = arith.constant dense<0.000000e+00> : vector<1xf32>
    %490 = vector.multi_reduction <add>, %489, %cst_105 [1] : vector<1x32xf32> to vector<1xf32>
    %491 = vector.shape_cast %490 : vector<1xf32> to vector<1x1xf32>
    %492 = vector.broadcast %491 : vector<1x1xf32> to vector<1x32xf32>
    %493 = arith.mulf %492, %42 : vector<1x32xf32>
    %494 = arith.addf %488, %493 : vector<1x32xf32>
    %cst_106 = arith.constant 1.000000e+00 : f32
    %495 = vector.broadcast %cst_106 : f32 to vector<1x32xf32>
    %496 = arith.addf %495, %494 : vector<1x32xf32>
    %497 = arith.divf %494, %496 : vector<1x32xf32>
    %498 = arith.mulf %470, %497 : vector<1x32xf32>
    %499 = math.rsqrt %494 : vector<1x32xf32>
    %500 = arith.mulf %498, %499 : vector<1x32xf32>
    %501 = vector.broadcast %500 : vector<1x32xf32> to vector<8x32xf32>
    %502 = arith.mulf %501, %9 : vector<8x32xf32>
    %503 = vector.broadcast %18 : vector<1x32xf32> to vector<8x32xf32>
    %504 = arith.mulf %502, %503 : vector<8x32xf32>
    %cst_107 = arith.constant dense<0.000000e+00> : vector<8xf32>
    %505 = vector.multi_reduction <add>, %504, %cst_107 [1] : vector<8x32xf32> to vector<8xf32>
    %506 = vector.shape_cast %505 : vector<8xf32> to vector<8x1xf32>
    %507 = vector.broadcast %506 : vector<8x1xf32> to vector<8x32xf32>
    %508 = vector.broadcast %18 : vector<1x32xf32> to vector<8x32xf32>
    %509 = arith.mulf %507, %508 : vector<8x32xf32>
    %510 = vector.broadcast %26 : vector<1x32xf32> to vector<8x32xf32>
    %511 = arith.mulf %502, %510 : vector<8x32xf32>
    %cst_108 = arith.constant dense<0.000000e+00> : vector<8xf32>
    %512 = vector.multi_reduction <add>, %511, %cst_108 [1] : vector<8x32xf32> to vector<8xf32>
    %513 = vector.shape_cast %512 : vector<8xf32> to vector<8x1xf32>
    %514 = vector.broadcast %513 : vector<8x1xf32> to vector<8x32xf32>
    %515 = vector.broadcast %26 : vector<1x32xf32> to vector<8x32xf32>
    %516 = arith.mulf %514, %515 : vector<8x32xf32>
    %517 = arith.addf %509, %516 : vector<8x32xf32>
    %518 = vector.broadcast %34 : vector<1x32xf32> to vector<8x32xf32>
    %519 = arith.mulf %502, %518 : vector<8x32xf32>
    %cst_109 = arith.constant dense<0.000000e+00> : vector<8xf32>
    %520 = vector.multi_reduction <add>, %519, %cst_109 [1] : vector<8x32xf32> to vector<8xf32>
    %521 = vector.shape_cast %520 : vector<8xf32> to vector<8x1xf32>
    %522 = vector.broadcast %521 : vector<8x1xf32> to vector<8x32xf32>
    %523 = vector.broadcast %34 : vector<1x32xf32> to vector<8x32xf32>
    %524 = arith.mulf %522, %523 : vector<8x32xf32>
    %525 = arith.addf %517, %524 : vector<8x32xf32>
    %526 = vector.broadcast %42 : vector<1x32xf32> to vector<8x32xf32>
    %527 = arith.mulf %502, %526 : vector<8x32xf32>
    %cst_110 = arith.constant dense<0.000000e+00> : vector<8xf32>
    %528 = vector.multi_reduction <add>, %527, %cst_110 [1] : vector<8x32xf32> to vector<8xf32>
    %529 = vector.shape_cast %528 : vector<8xf32> to vector<8x1xf32>
    %530 = vector.broadcast %529 : vector<8x1xf32> to vector<8x32xf32>
    %531 = vector.broadcast %42 : vector<1x32xf32> to vector<8x32xf32>
    %532 = arith.mulf %530, %531 : vector<8x32xf32>
    %533 = arith.addf %525, %532 : vector<8x32xf32>
    %cst_111 = arith.constant dense<0xFF800000> : vector<8xf32>
    %534 = vector.multi_reduction <maximumf>, %467, %cst_111 [1] : vector<8x32xf32> to vector<8xf32>
    %535 = vector.shape_cast %534 : vector<8xf32> to vector<8x1xf32>
    %cst_112 = arith.constant 0.000000e+00 : f32
    %536 = vector.broadcast %cst_112 : f32 to vector<8x1xf32>
    %537 = arith.maximumf %535, %536 : vector<8x1xf32>
    %538 = vector.broadcast %537 : vector<8x1xf32> to vector<8x32xf32>
    %539 = arith.subf %467, %538 : vector<8x32xf32>
    %540 = math.exp %539 : vector<8x32xf32>
    %cst_113 = arith.constant dense<0.000000e+00> : vector<8xf32>
    %541 = vector.multi_reduction <add>, %540, %cst_113 [1] : vector<8x32xf32> to vector<8xf32>
    %542 = vector.shape_cast %541 : vector<8xf32> to vector<8x1xf32>
    %cst_114 = arith.constant 1.250000e-01 : f32
    %543 = vector.broadcast %cst_114 : f32 to vector<8x1xf32>
    %544 = arith.mulf %542, %543 : vector<8x1xf32>
    %cst_115 = arith.constant 0.000000e+00 : f32
    %545 = vector.broadcast %cst_115 : f32 to vector<8x1xf32>
    %546 = arith.subf %545, %537 : vector<8x1xf32>
    %547 = math.exp %546 : vector<8x1xf32>
    %548 = arith.addf %544, %547 : vector<8x1xf32>
    %549 = vector.broadcast %548 : vector<8x1xf32> to vector<8x32xf32>
    %550 = arith.divf %540, %549 : vector<8x32xf32>
    %551 = arith.mulf %550, %8 : vector<8x32xf32>
    %cst_116 = arith.constant dense<0.000000e+00> : vector<32xf32>
    %552 = vector.multi_reduction <add>, %551, %cst_116 [0] : vector<8x32xf32> to vector<32xf32>
    %553 = vector.shape_cast %552 : vector<32xf32> to vector<1x32xf32>
    %554 = arith.addf %553, %0 : vector<1x32xf32>
    %cst_117 = arith.constant dense<0xFF800000> : vector<8xf32>
    %555 = vector.multi_reduction <maximumf>, %533, %cst_117 [1] : vector<8x32xf32> to vector<8xf32>
    %556 = vector.shape_cast %555 : vector<8xf32> to vector<8x1xf32>
    %cst_118 = arith.constant 0.000000e+00 : f32
    %557 = vector.broadcast %cst_118 : f32 to vector<8x1xf32>
    %558 = arith.maximumf %556, %557 : vector<8x1xf32>
    %559 = vector.broadcast %558 : vector<8x1xf32> to vector<8x32xf32>
    %560 = arith.subf %533, %559 : vector<8x32xf32>
    %561 = math.exp %560 : vector<8x32xf32>
    %cst_119 = arith.constant dense<0.000000e+00> : vector<8xf32>
    %562 = vector.multi_reduction <add>, %561, %cst_119 [1] : vector<8x32xf32> to vector<8xf32>
    %563 = vector.shape_cast %562 : vector<8xf32> to vector<8x1xf32>
    %cst_120 = arith.constant 1.250000e-01 : f32
    %564 = vector.broadcast %cst_120 : f32 to vector<8x1xf32>
    %565 = arith.mulf %563, %564 : vector<8x1xf32>
    %cst_121 = arith.constant 0.000000e+00 : f32
    %566 = vector.broadcast %cst_121 : f32 to vector<8x1xf32>
    %567 = arith.subf %566, %558 : vector<8x1xf32>
    %568 = math.exp %567 : vector<8x1xf32>
    %569 = arith.addf %565, %568 : vector<8x1xf32>
    %570 = vector.broadcast %569 : vector<8x1xf32> to vector<8x32xf32>
    %571 = arith.divf %561, %570 : vector<8x32xf32>
    %572 = arith.mulf %571, %9 : vector<8x32xf32>
    %cst_122 = arith.constant dense<0.000000e+00> : vector<32xf32>
    %573 = vector.multi_reduction <add>, %572, %cst_122 [0] : vector<8x32xf32> to vector<32xf32>
    %574 = vector.shape_cast %573 : vector<32xf32> to vector<1x32xf32>
    %575 = arith.addf %574, %0 : vector<1x32xf32>
    %576 = arith.mulf %554, %554 : vector<1x32xf32>
    %577 = arith.addf %554, %575 : vector<1x32xf32>
    %578 = arith.mulf %575, %575 : vector<1x32xf32>
    %579 = arith.addf %576, %578 : vector<1x32xf32>
    %580 = arith.mulf %577, %18 : vector<1x32xf32>
    %cst_123 = arith.constant dense<0.000000e+00> : vector<1xf32>
    %581 = vector.multi_reduction <add>, %580, %cst_123 [1] : vector<1x32xf32> to vector<1xf32>
    %582 = vector.shape_cast %581 : vector<1xf32> to vector<1x1xf32>
    %583 = vector.broadcast %582 : vector<1x1xf32> to vector<1x32xf32>
    %584 = arith.mulf %583, %18 : vector<1x32xf32>
    %585 = arith.mulf %577, %26 : vector<1x32xf32>
    %cst_124 = arith.constant dense<0.000000e+00> : vector<1xf32>
    %586 = vector.multi_reduction <add>, %585, %cst_124 [1] : vector<1x32xf32> to vector<1xf32>
    %587 = vector.shape_cast %586 : vector<1xf32> to vector<1x1xf32>
    %588 = vector.broadcast %587 : vector<1x1xf32> to vector<1x32xf32>
    %589 = arith.mulf %588, %26 : vector<1x32xf32>
    %590 = arith.addf %584, %589 : vector<1x32xf32>
    %591 = arith.mulf %577, %34 : vector<1x32xf32>
    %cst_125 = arith.constant dense<0.000000e+00> : vector<1xf32>
    %592 = vector.multi_reduction <add>, %591, %cst_125 [1] : vector<1x32xf32> to vector<1xf32>
    %593 = vector.shape_cast %592 : vector<1xf32> to vector<1x1xf32>
    %594 = vector.broadcast %593 : vector<1x1xf32> to vector<1x32xf32>
    %595 = arith.mulf %594, %34 : vector<1x32xf32>
    %596 = arith.addf %590, %595 : vector<1x32xf32>
    %597 = arith.mulf %577, %42 : vector<1x32xf32>
    %cst_126 = arith.constant dense<0.000000e+00> : vector<1xf32>
    %598 = vector.multi_reduction <add>, %597, %cst_126 [1] : vector<1x32xf32> to vector<1xf32>
    %599 = vector.shape_cast %598 : vector<1xf32> to vector<1x1xf32>
    %600 = vector.broadcast %599 : vector<1x1xf32> to vector<1x32xf32>
    %601 = arith.mulf %600, %42 : vector<1x32xf32>
    %602 = arith.addf %596, %601 : vector<1x32xf32>
    %cst_127 = arith.constant 6.250000e-02 : f32
    %603 = vector.broadcast %cst_127 : f32 to vector<1x32xf32>
    %604 = arith.mulf %602, %603 : vector<1x32xf32>
    %605 = arith.mulf %579, %18 : vector<1x32xf32>
    %cst_128 = arith.constant dense<0.000000e+00> : vector<1xf32>
    %606 = vector.multi_reduction <add>, %605, %cst_128 [1] : vector<1x32xf32> to vector<1xf32>
    %607 = vector.shape_cast %606 : vector<1xf32> to vector<1x1xf32>
    %608 = vector.broadcast %607 : vector<1x1xf32> to vector<1x32xf32>
    %609 = arith.mulf %608, %18 : vector<1x32xf32>
    %610 = arith.mulf %579, %26 : vector<1x32xf32>
    %cst_129 = arith.constant dense<0.000000e+00> : vector<1xf32>
    %611 = vector.multi_reduction <add>, %610, %cst_129 [1] : vector<1x32xf32> to vector<1xf32>
    %612 = vector.shape_cast %611 : vector<1xf32> to vector<1x1xf32>
    %613 = vector.broadcast %612 : vector<1x1xf32> to vector<1x32xf32>
    %614 = arith.mulf %613, %26 : vector<1x32xf32>
    %615 = arith.addf %609, %614 : vector<1x32xf32>
    %616 = arith.mulf %579, %34 : vector<1x32xf32>
    %cst_130 = arith.constant dense<0.000000e+00> : vector<1xf32>
    %617 = vector.multi_reduction <add>, %616, %cst_130 [1] : vector<1x32xf32> to vector<1xf32>
    %618 = vector.shape_cast %617 : vector<1xf32> to vector<1x1xf32>
    %619 = vector.broadcast %618 : vector<1x1xf32> to vector<1x32xf32>
    %620 = arith.mulf %619, %34 : vector<1x32xf32>
    %621 = arith.addf %615, %620 : vector<1x32xf32>
    %622 = arith.mulf %579, %42 : vector<1x32xf32>
    %cst_131 = arith.constant dense<0.000000e+00> : vector<1xf32>
    %623 = vector.multi_reduction <add>, %622, %cst_131 [1] : vector<1x32xf32> to vector<1xf32>
    %624 = vector.shape_cast %623 : vector<1xf32> to vector<1x1xf32>
    %625 = vector.broadcast %624 : vector<1x1xf32> to vector<1x32xf32>
    %626 = arith.mulf %625, %42 : vector<1x32xf32>
    %627 = arith.addf %621, %626 : vector<1x32xf32>
    %cst_132 = arith.constant 6.250000e-02 : f32
    %628 = vector.broadcast %cst_132 : f32 to vector<1x32xf32>
    %629 = arith.mulf %627, %628 : vector<1x32xf32>
    %630 = arith.mulf %604, %604 : vector<1x32xf32>
    %631 = arith.subf %629, %630 : vector<1x32xf32>
    %cst_133 = arith.constant 9.99999974E-6 : f32
    %632 = vector.broadcast %cst_133 : f32 to vector<1x32xf32>
    %633 = arith.addf %631, %632 : vector<1x32xf32>
    %634 = math.rsqrt %633 : vector<1x32xf32>
    %635 = arith.mulf %634, %1 : vector<1x32xf32>
    %636 = arith.subf %554, %604 : vector<1x32xf32>
    %637 = arith.mulf %636, %635 : vector<1x32xf32>
    %638 = arith.addf %637, %2 : vector<1x32xf32>
    %639 = arith.mulf %638, %638 : vector<1x32xf32>
    %640 = arith.mulf %639, %18 : vector<1x32xf32>
    %cst_134 = arith.constant dense<0.000000e+00> : vector<1xf32>
    %641 = vector.multi_reduction <add>, %640, %cst_134 [1] : vector<1x32xf32> to vector<1xf32>
    %642 = vector.shape_cast %641 : vector<1xf32> to vector<1x1xf32>
    %643 = vector.broadcast %642 : vector<1x1xf32> to vector<1x32xf32>
    %644 = arith.mulf %643, %18 : vector<1x32xf32>
    %645 = arith.mulf %639, %26 : vector<1x32xf32>
    %cst_135 = arith.constant dense<0.000000e+00> : vector<1xf32>
    %646 = vector.multi_reduction <add>, %645, %cst_135 [1] : vector<1x32xf32> to vector<1xf32>
    %647 = vector.shape_cast %646 : vector<1xf32> to vector<1x1xf32>
    %648 = vector.broadcast %647 : vector<1x1xf32> to vector<1x32xf32>
    %649 = arith.mulf %648, %26 : vector<1x32xf32>
    %650 = arith.addf %644, %649 : vector<1x32xf32>
    %651 = arith.mulf %639, %34 : vector<1x32xf32>
    %cst_136 = arith.constant dense<0.000000e+00> : vector<1xf32>
    %652 = vector.multi_reduction <add>, %651, %cst_136 [1] : vector<1x32xf32> to vector<1xf32>
    %653 = vector.shape_cast %652 : vector<1xf32> to vector<1x1xf32>
    %654 = vector.broadcast %653 : vector<1x1xf32> to vector<1x32xf32>
    %655 = arith.mulf %654, %34 : vector<1x32xf32>
    %656 = arith.addf %650, %655 : vector<1x32xf32>
    %657 = arith.mulf %639, %42 : vector<1x32xf32>
    %cst_137 = arith.constant dense<0.000000e+00> : vector<1xf32>
    %658 = vector.multi_reduction <add>, %657, %cst_137 [1] : vector<1x32xf32> to vector<1xf32>
    %659 = vector.shape_cast %658 : vector<1xf32> to vector<1x1xf32>
    %660 = vector.broadcast %659 : vector<1x1xf32> to vector<1x32xf32>
    %661 = arith.mulf %660, %42 : vector<1x32xf32>
    %662 = arith.addf %656, %661 : vector<1x32xf32>
    %cst_138 = arith.constant 1.000000e+00 : f32
    %663 = vector.broadcast %cst_138 : f32 to vector<1x32xf32>
    %664 = arith.addf %663, %662 : vector<1x32xf32>
    %665 = arith.divf %662, %664 : vector<1x32xf32>
    %666 = arith.mulf %638, %665 : vector<1x32xf32>
    %667 = math.rsqrt %662 : vector<1x32xf32>
    %668 = arith.mulf %666, %667 : vector<1x32xf32>
    %669 = arith.subf %575, %604 : vector<1x32xf32>
    %670 = arith.mulf %669, %635 : vector<1x32xf32>
    %671 = arith.addf %670, %2 : vector<1x32xf32>
    %672 = arith.mulf %671, %671 : vector<1x32xf32>
    %673 = arith.mulf %672, %18 : vector<1x32xf32>
    %cst_139 = arith.constant dense<0.000000e+00> : vector<1xf32>
    %674 = vector.multi_reduction <add>, %673, %cst_139 [1] : vector<1x32xf32> to vector<1xf32>
    %675 = vector.shape_cast %674 : vector<1xf32> to vector<1x1xf32>
    %676 = vector.broadcast %675 : vector<1x1xf32> to vector<1x32xf32>
    %677 = arith.mulf %676, %18 : vector<1x32xf32>
    %678 = arith.mulf %672, %26 : vector<1x32xf32>
    %cst_140 = arith.constant dense<0.000000e+00> : vector<1xf32>
    %679 = vector.multi_reduction <add>, %678, %cst_140 [1] : vector<1x32xf32> to vector<1xf32>
    %680 = vector.shape_cast %679 : vector<1xf32> to vector<1x1xf32>
    %681 = vector.broadcast %680 : vector<1x1xf32> to vector<1x32xf32>
    %682 = arith.mulf %681, %26 : vector<1x32xf32>
    %683 = arith.addf %677, %682 : vector<1x32xf32>
    %684 = arith.mulf %672, %34 : vector<1x32xf32>
    %cst_141 = arith.constant dense<0.000000e+00> : vector<1xf32>
    %685 = vector.multi_reduction <add>, %684, %cst_141 [1] : vector<1x32xf32> to vector<1xf32>
    %686 = vector.shape_cast %685 : vector<1xf32> to vector<1x1xf32>
    %687 = vector.broadcast %686 : vector<1x1xf32> to vector<1x32xf32>
    %688 = arith.mulf %687, %34 : vector<1x32xf32>
    %689 = arith.addf %683, %688 : vector<1x32xf32>
    %690 = arith.mulf %672, %42 : vector<1x32xf32>
    %cst_142 = arith.constant dense<0.000000e+00> : vector<1xf32>
    %691 = vector.multi_reduction <add>, %690, %cst_142 [1] : vector<1x32xf32> to vector<1xf32>
    %692 = vector.shape_cast %691 : vector<1xf32> to vector<1x1xf32>
    %693 = vector.broadcast %692 : vector<1x1xf32> to vector<1x32xf32>
    %694 = arith.mulf %693, %42 : vector<1x32xf32>
    %695 = arith.addf %689, %694 : vector<1x32xf32>
    %cst_143 = arith.constant 1.000000e+00 : f32
    %696 = vector.broadcast %cst_143 : f32 to vector<1x32xf32>
    %697 = arith.addf %696, %695 : vector<1x32xf32>
    %698 = arith.divf %695, %697 : vector<1x32xf32>
    %699 = arith.mulf %671, %698 : vector<1x32xf32>
    %700 = math.rsqrt %695 : vector<1x32xf32>
    %701 = arith.mulf %699, %700 : vector<1x32xf32>
    %c0_144 = arith.constant 0 : index
    %c0_145 = arith.constant 0 : index
    %702 = vector.load %arg3[%c0_144, %c0_145] : memref<2x32xf32, #tpu.memory_space<vmem>>, vector<1x32xf32>
    tpu.vector_store %arg3[%c0_144, %c0_145], %668 {strides = array<i32>} : memref<2x32xf32, #tpu.memory_space<vmem>>, vector<1x32xf32>,
    %703 = vector.broadcast %18 : vector<1x32xf32> to vector<8x32xf32>
    %704 = arith.mulf %550, %703 : vector<8x32xf32>
    %cst_146 = arith.constant dense<0.000000e+00> : vector<8xf32>
    %705 = vector.multi_reduction <add>, %704, %cst_146 [1] : vector<8x32xf32> to vector<8xf32>
    %706 = vector.shape_cast %705 : vector<8xf32> to vector<8x1xf32>
    %cst_147 = arith.constant 1.250000e-01 : f32
    %707 = vector.broadcast %cst_147 : f32 to vector<8x1xf32>
    %708 = arith.mulf %706, %707 : vector<8x1xf32>
    %709 = vector.broadcast %708 : vector<8x1xf32> to vector<8x4xf32>
    %710 = vector.broadcast %48 : vector<1x4xf32> to vector<8x4xf32>
    %711 = arith.mulf %709, %710 : vector<8x4xf32>
    %712 = vector.broadcast %26 : vector<1x32xf32> to vector<8x32xf32>
    %713 = arith.mulf %550, %712 : vector<8x32xf32>
    %cst_148 = arith.constant dense<0.000000e+00> : vector<8xf32>
    %714 = vector.multi_reduction <add>, %713, %cst_148 [1] : vector<8x32xf32> to vector<8xf32>
    %715 = vector.shape_cast %714 : vector<8xf32> to vector<8x1xf32>
    %cst_149 = arith.constant 1.250000e-01 : f32
    %716 = vector.broadcast %cst_149 : f32 to vector<8x1xf32>
    %717 = arith.mulf %715, %716 : vector<8x1xf32>
    %718 = vector.broadcast %717 : vector<8x1xf32> to vector<8x4xf32>
    %719 = vector.broadcast %53 : vector<1x4xf32> to vector<8x4xf32>
    %720 = arith.mulf %718, %719 : vector<8x4xf32>
    %721 = arith.addf %711, %720 : vector<8x4xf32>
    %722 = vector.broadcast %34 : vector<1x32xf32> to vector<8x32xf32>
    %723 = arith.mulf %550, %722 : vector<8x32xf32>
    %cst_150 = arith.constant dense<0.000000e+00> : vector<8xf32>
    %724 = vector.multi_reduction <add>, %723, %cst_150 [1] : vector<8x32xf32> to vector<8xf32>
    %725 = vector.shape_cast %724 : vector<8xf32> to vector<8x1xf32>
    %cst_151 = arith.constant 1.250000e-01 : f32
    %726 = vector.broadcast %cst_151 : f32 to vector<8x1xf32>
    %727 = arith.mulf %725, %726 : vector<8x1xf32>
    %728 = vector.broadcast %727 : vector<8x1xf32> to vector<8x4xf32>
    %729 = vector.broadcast %58 : vector<1x4xf32> to vector<8x4xf32>
    %730 = arith.mulf %728, %729 : vector<8x4xf32>
    %731 = arith.addf %721, %730 : vector<8x4xf32>
    %732 = vector.broadcast %42 : vector<1x32xf32> to vector<8x32xf32>
    %733 = arith.mulf %550, %732 : vector<8x32xf32>
    %cst_152 = arith.constant dense<0.000000e+00> : vector<8xf32>
    %734 = vector.multi_reduction <add>, %733, %cst_152 [1] : vector<8x32xf32> to vector<8xf32>
    %735 = vector.shape_cast %734 : vector<8xf32> to vector<8x1xf32>
    %cst_153 = arith.constant 1.250000e-01 : f32
    %736 = vector.broadcast %cst_153 : f32 to vector<8x1xf32>
    %737 = arith.mulf %735, %736 : vector<8x1xf32>
    %738 = vector.broadcast %737 : vector<8x1xf32> to vector<8x4xf32>
    %739 = vector.broadcast %63 : vector<1x4xf32> to vector<8x4xf32>
    %740 = arith.mulf %738, %739 : vector<8x4xf32>
    %741 = arith.addf %731, %740 : vector<8x4xf32>
    %c0_154 = arith.constant 0 : index
    %c0_155 = arith.constant 0 : index
    %742 = vector.load %arg4[%c0_154, %c0_155] : memref<16x4xf32, #tpu.memory_space<vmem>>, vector<8x4xf32>
    tpu.vector_store %arg4[%c0_154, %c0_155], %741 {strides = array<i32>} : memref<16x4xf32, #tpu.memory_space<vmem>>, vector<8x4xf32>,
    %c1_156 = arith.constant 1 : index
    %c0_157 = arith.constant 0 : index
    %743 = vector.load %arg3[%c1_156, %c0_157] : memref<2x32xf32, #tpu.memory_space<vmem>>, vector<1x32xf32>
    tpu.vector_store %arg3[%c1_156, %c0_157], %701 {strides = array<i32>} : memref<2x32xf32, #tpu.memory_space<vmem>>, vector<1x32xf32>,
    %744 = vector.broadcast %18 : vector<1x32xf32> to vector<8x32xf32>
    %745 = arith.mulf %571, %744 : vector<8x32xf32>
    %cst_158 = arith.constant dense<0.000000e+00> : vector<8xf32>
    %746 = vector.multi_reduction <add>, %745, %cst_158 [1] : vector<8x32xf32> to vector<8xf32>
    %747 = vector.shape_cast %746 : vector<8xf32> to vector<8x1xf32>
    %cst_159 = arith.constant 1.250000e-01 : f32
    %748 = vector.broadcast %cst_159 : f32 to vector<8x1xf32>
    %749 = arith.mulf %747, %748 : vector<8x1xf32>
    %750 = vector.broadcast %749 : vector<8x1xf32> to vector<8x4xf32>
    %751 = vector.broadcast %48 : vector<1x4xf32> to vector<8x4xf32>
    %752 = arith.mulf %750, %751 : vector<8x4xf32>
    %753 = vector.broadcast %26 : vector<1x32xf32> to vector<8x32xf32>
    %754 = arith.mulf %571, %753 : vector<8x32xf32>
    %cst_160 = arith.constant dense<0.000000e+00> : vector<8xf32>
    %755 = vector.multi_reduction <add>, %754, %cst_160 [1] : vector<8x32xf32> to vector<8xf32>
    %756 = vector.shape_cast %755 : vector<8xf32> to vector<8x1xf32>
    %cst_161 = arith.constant 1.250000e-01 : f32
    %757 = vector.broadcast %cst_161 : f32 to vector<8x1xf32>
    %758 = arith.mulf %756, %757 : vector<8x1xf32>
    %759 = vector.broadcast %758 : vector<8x1xf32> to vector<8x4xf32>
    %760 = vector.broadcast %53 : vector<1x4xf32> to vector<8x4xf32>
    %761 = arith.mulf %759, %760 : vector<8x4xf32>
    %762 = arith.addf %752, %761 : vector<8x4xf32>
    %763 = vector.broadcast %34 : vector<1x32xf32> to vector<8x32xf32>
    %764 = arith.mulf %571, %763 : vector<8x32xf32>
    %cst_162 = arith.constant dense<0.000000e+00> : vector<8xf32>
    %765 = vector.multi_reduction <add>, %764, %cst_162 [1] : vector<8x32xf32> to vector<8xf32>
    %766 = vector.shape_cast %765 : vector<8xf32> to vector<8x1xf32>
    %cst_163 = arith.constant 1.250000e-01 : f32
    %767 = vector.broadcast %cst_163 : f32 to vector<8x1xf32>
    %768 = arith.mulf %766, %767 : vector<8x1xf32>
    %769 = vector.broadcast %768 : vector<8x1xf32> to vector<8x4xf32>
    %770 = vector.broadcast %58 : vector<1x4xf32> to vector<8x4xf32>
    %771 = arith.mulf %769, %770 : vector<8x4xf32>
    %772 = arith.addf %762, %771 : vector<8x4xf32>
    %773 = vector.broadcast %42 : vector<1x32xf32> to vector<8x32xf32>
    %774 = arith.mulf %571, %773 : vector<8x32xf32>
    %cst_164 = arith.constant dense<0.000000e+00> : vector<8xf32>
    %775 = vector.multi_reduction <add>, %774, %cst_164 [1] : vector<8x32xf32> to vector<8xf32>
    %776 = vector.shape_cast %775 : vector<8xf32> to vector<8x1xf32>
    %cst_165 = arith.constant 1.250000e-01 : f32
    %777 = vector.broadcast %cst_165 : f32 to vector<8x1xf32>
    %778 = arith.mulf %776, %777 : vector<8x1xf32>
    %779 = vector.broadcast %778 : vector<8x1xf32> to vector<8x4xf32>
    %780 = vector.broadcast %63 : vector<1x4xf32> to vector<8x4xf32>
    %781 = arith.mulf %779, %780 : vector<8x4xf32>
    %782 = arith.addf %772, %781 : vector<8x4xf32>
    %c8 = arith.constant 8 : index
    %c0_166 = arith.constant 0 : index
    %783 = vector.load %arg4[%c8, %c0_166] : memref<16x4xf32, #tpu.memory_space<vmem>>, vector<8x4xf32>
    tpu.vector_store %arg4[%c8, %c0_166], %782 {strides = array<i32>} : memref<16x4xf32, #tpu.memory_space<vmem>>, vector<8x4xf32>,
    return
  }
}

</mosaic_0001>

<bundles_post_ra>
// kernel: capsule_forward.1
= control target key start
LH: loop header
LB: loop body
LE: loop exit
PB: predicated region body
PF: predicated region fallthrough
CT: control target
= control target key end

     0   :  { %vm27_vm0 = vcmask 130048   ;;  %vm135_vm1 = vcmask 261120   ;;  %v889_v3 = vmov 0.0   ;;  %v23_v9 = vlaneseq  ;;  %s1295_s1 = inlined_call_operand.vmem [shape: f32[16,32], index: 1, kind: input, shape index: {}]   ;;  %s1296_s0 = inlined_call_operand.vmem [shape: f32[16,16], index: 0, kind: input, shape index: {}]   ;;  %s1297_s2 = inlined_call_operand.vmem [shape: f32[3,32], index: 2, kind: input, shape index: {}]   ;;  %s1298_s4 = inlined_call_operand.vmem [shape: f32[16,4], index: 4, kind: output, shape index: {1}]   ;;  %s1299_s3 = inlined_call_operand.vmem [shape: f32[2,32], index: 3, kind: output, shape index: {0}]  }
   0x1   :  { %v21_v0 = vld [vmem:[%s1295_s1] sm:$0xff]  ;;  %v22_v1 = vld [vmem:[%s1295_s1 + $0x8] sm:$0xff]  ;;  %v136_v4 = vsel %vm135_vm1, 1.0, %v889_v3  ;;  %vm166_vm12 = vcmask 253952  }
   0x2   :  { %v19_v2 = vld [vmem:[%s1296_s0] sm:$0xff]  ;;  %v827_v5 = vpack.c.bf16 %v22_v1, %v21_v0  ;;  %137 = vadd.xlane.f32.xlu0 %v136_v4  ;;  %v20_v6 = vld [vmem:[%s1296_s0 + $0x8] sm:$0xff]  ;;  %v24_v11 = vshrl.u32 %v23_v9, 7  ;;  %v946_v28 = vand.u32 127, %v23_v9 }
   0x3   :  { %824 = vmatprep.mubr.msk.f32.mxu0 %vm27_vm0, %v19_v2  ;;  %v934_v13 = vld [vmem:[%s1297_s2] sm:$0x1] }
   0x4   :  { %828 = vmatprep.subr.bf16.mxu0 %v827_v5  ;;  %v929_v12 = vsub.s32 0, %v24_v11  ;;  %vm115_vm2 = vcmp.ge.s32.totalorder %v946_v28, 8  ;;  %vm116_vm3 = vcmp.lt.s32.totalorder %v946_v28, 16  ;;  %vm119_vm4 = vcmp.ge.s32.totalorder %v946_v28, 16 }
   0x5   :  { %830 = vmatpush3.bf16.msra.mxu0 %v827_v5  ;;  %vm120_vm5 = vcmp.lt.s32.totalorder %v946_v28, 24  ;;  %vm123_vm6 = vcmp.ge.s32.totalorder %v946_v28, 24  ;;  %vm124_vm7 = vcmp.lt.s32.totalorder %v946_v28, 32  ;;  %vm112_vm8 = vcmp.lt.s32.totalorder %v946_v28, 8  ;;  %vm117_vm9 = vmand %vm115_vm2, %vm116_vm3 }
   0x6   :  { %v26_v14 = vrot.slane %v934_v13, %v929_v12  ;;  %vm121_vm10 = vmand %vm119_vm4, %vm120_vm5  ;;  %v962_v39 = vsel %vm112_vm8, 1.0, %v889_v3  ;;  %v965_v40 = vsel %vm117_vm9, 1.0, %v889_v3  ;;  %vm129_vm13 = vcmp.eq.s32.totalorder %v946_v28, 1 }
   0x7   :  { %vm125_vm11 = vmand %vm123_vm6, %vm124_vm7  ;;  %v968_v41 = vsel %vm121_vm10, 1.0, %v889_v3  ;;  %vm127_vm14 = vcmp.eq.s32.totalorder %v946_v28, 0  ;;  %vm131_vm15 = vcmp.eq.s32.totalorder %v946_v28, 2 }
   0x8   :  { %825 = vmatmul.mubr.msk.f32.vlgmr.msra.gmra.mrb[0].mxu0 %vm27_vm0, %v20_v6  ;;  %v977_v45 = vsel %vm125_vm11, 1.0, %v889_v3  ;;  %vm133_vm0 = vcmp.eq.s32.totalorder %v946_v28, 3 }
  0x8f   :  { %v138_v7 = vpop.xlane.xlu0 %137 }
  0x90   :  { %v139_v8 = vmul.f32 0.125, %v138_v7 }
  0x92   :  { %v140_v10 = vadd.f32 1.0, %v139_v8 }
  0x94   :  { %832 = vrcp.f32 %v140_v10 }
  0x9e   :  { %v833_v15 = vpop.eup %832 }
  0xdb   :  { %v826_v16 = vpop.f32.mrb[0].mxu0 }
  0xdc   :  { %v938_v17 = vadd.f32 %v826_v16, %v26_v14  ;;  %v100_v18 = vpop.f32.mrb[1].mxu0 }
  0xdd   :  { %v940_v19 = vadd.f32 %v100_v18, %v26_v14 }
  0xde   :  { %v152_v20 = vmul.f32 %v833_v15, %v938_v17 }
  0xdf   :  { %v143_v21 = vmul.f32 %v833_v15, %v940_v19 }
  0xe0   :  { %v153_v22 = vsel %vm135_vm1, %v152_v20, 0.0 }
  0xe1   :  { %v154_v23 = vrot.slane %v153_v22, 4  ;;  %v144_v24 = vsel %vm135_vm1, %v143_v21, 0.0 }
  0xe2   :  { %v145_v25 = vrot.slane %v144_v24, 4 }
  0xe3   :  { %v155_v26 = vadd.f32 %v154_v23, %v153_v22 }
  0xe4   :  { %v146_v27 = vadd.f32 %v145_v25, %v144_v24 }
  0xe5   :  { %v156_v29 = vrot.slane %v155_v26, 2 }
  0xe6   :  { %v147_v30 = vrot.slane %v146_v27, 2 }
  0xe7   :  { %v157_v31 = vadd.f32 %v156_v29, %v155_v26 }
  0xe8   :  { %v148_v32 = vadd.f32 %v147_v30, %v146_v27 }
  0xe9   :  { %v158_v33 = vrot.slane %v157_v31, 1 }
  0xea   :  { %v149_v34 = vrot.slane %v148_v32, 1 }
  0xeb   :  { %v159_v35 = vadd.f32 %v158_v33, %v157_v31 }
  0xec   :  { %v150_v36 = vadd.f32 %v149_v34, %v148_v32  ;;  %v1006_v32 = vld [vmem:[%s1297_s2 + $0x1] sm:$0x1] }
  0xed   :  { %v956_v37 = vadd.f32 %v159_v35, %v934_v13 }
  0xee   :  { %v959_v38 = vadd.f32 %v150_v36, %v934_v13 }
  0xef   :  { %v163_v44 = vmul.f32 %v956_v37, %v956_v37 }
  0xf0   :  { %v162_v42 = vadd.f32 %v956_v37, %v959_v38  ;;  %v161_v43 = vmul.f32 %v959_v38, %v959_v38 }
  0xf2   :  { %v171_v46 = vmul.f32 %v162_v42, %v965_v40  ;;  %v165_v47 = vmul.f32 %v162_v42, %v962_v39  ;;  %v177_v48 = vmul.f32 %v162_v42, %v968_v41  ;;  %v183_v51 = vmul.f32 %v162_v42, %v977_v45  ;;  %v1014_v42 = vld [vmem:[%s1297_s2 + $0x2] sm:$0x1] }
  0xf3   :  { %v164_v52 = vadd.f32 %v163_v44, %v161_v43 }
  0xf4   :  { %v172_v49 = vsel %vm166_vm12, %v171_v46, 0.0  ;;  %v167_v50 = vsel %vm166_vm12, %v165_v47, 0.0  ;;  %v178_v53 = vsel %vm166_vm12, %v177_v48, 0.0  ;;  %v184_v54 = vsel %vm166_vm12, %v183_v51, 0.0 }
  0xf5   :  { %173 = vadd.xlane.f32.xlu1 %v172_v49  ;;  %168 = vadd.xlane.f32.xlu0 %v167_v50  ;;  %v195_v55 = vmul.f32 %v164_v52, %v965_v40  ;;  %v190_v56 = vmul.f32 %v164_v52, %v962_v39  ;;  %v201_v59 = vmul.f32 %v164_v52, %v968_v41 }
  0xf6   :  { %v207_v60 = vmul.f32 %v164_v52, %v977_v45 }
  0xf7   :  { %v196_v57 = vsel %vm166_vm12, %v195_v55, 0.0  ;;  %v191_v58 = vsel %vm166_vm12, %v190_v56, 0.0  ;;  %v202_v61 = vsel %vm166_vm12, %v201_v59, 0.0 }
  0xf8   :  { %v208_v62 = vsel %vm166_vm12, %v207_v60, 0.0 }
  0xf9   :  { %179 = vadd.xlane.f32.xlu1 %v178_v53  ;;  %185 = vadd.xlane.f32.xlu0 %v184_v54 }
  0xfd   :  { %197 = vadd.xlane.f32.xlu1 %v196_v57  ;;  %192 = vadd.xlane.f32.xlu0 %v191_v58 }
 0x101   :  { %203 = vadd.xlane.f32.xlu1 %v202_v61  ;;  %209 = vadd.xlane.f32.xlu0 %v208_v62 }
 0x182   :  { %v174_v63 = vpop.xlane.xlu1 %173  ;;  %v169_v0 = vpop.xlane.xlu0 %168 }
 0x183   :  { %v175_v1 = vmul.f32 %v174_v63, %v965_v40  ;;  %v170_v2 = vmul.f32 %v169_v0, %v962_v39 }
 0x185   :  { %v176_v6 = vadd.f32 %v175_v1, %v170_v2 }
 0x186   :  { %v180_v4 = vpop.xlane.xlu1 %179  ;;  %v186_v5 = vpop.xlane.xlu0 %185 }
 0x187   :  { %v181_v7 = vmul.f32 %v180_v4, %v968_v41  ;;  %v187_v11 = vmul.f32 %v186_v5, %v977_v45 }
 0x189   :  { %v182_v8 = vadd.f32 %v181_v7, %v176_v6 }
 0x18a   :  { %v198_v9 = vpop.xlane.xlu1 %197  ;;  %v193_v10 = vpop.xlane.xlu0 %192 }
 0x18b   :  { %v199_v14 = vmul.f32 %v198_v9, %v965_v40  ;;  %v194_v15 = vmul.f32 %v193_v10, %v962_v39  ;;  %v188_v16 = vadd.f32 %v187_v11, %v182_v8 }
 0x18d   :  { %v200_v21 = vadd.f32 %v199_v14, %v194_v15  ;;  %v189_v23 = vmul.f32 0.0625, %v188_v16 }
 0x18e   :  { %v204_v18 = vpop.xlane.xlu1 %203  ;;  %v210_v20 = vpop.xlane.xlu0 %209 }
 0x18f   :  { %v205_v22 = vmul.f32 %v204_v18, %v968_v41  ;;  %v211_v25 = vmul.f32 %v210_v20, %v977_v45  ;;  %v214_v27 = vmul.f32 %v189_v23, %v189_v23  ;;  %v219_v34 = vsub.f32 %v959_v38, %v189_v23 }
 0x190   :  { %v280_v35 = vsub.f32 %v956_v37, %v189_v23 }
 0x191   :  { %v206_v24 = vadd.f32 %v205_v22, %v200_v21 }
 0x193   :  { %v212_v26 = vadd.f32 %v211_v25, %v206_v24 }
 0x195   :  { %v213_v29 = vmul.f32 0.0625, %v212_v26 }
 0x197   :  { %v215_v30 = vsub.f32 %v213_v29, %v214_v27 }
 0x199   :  { %v216_v31 = vadd.f32 1e-05, %v215_v30 }
 0x19b   :  { %834 = vrsqrt.f32 %v216_v31 }
 0x1a5   :  { %v835_v33 = vpop.eup %834 }
 0x1a6   :  { %v218_v36 = vmul.f32 %v835_v33, %v1006_v32 }
 0x1a8   :  { %v220_v43 = vmul.f32 %v219_v34, %v218_v36  ;;  %v281_v44 = vmul.f32 %v280_v35, %v218_v36 }
 0x1aa   :  { %v221_v46 = vadd.f32 %v220_v43, %v1014_v42  ;;  %v282_v47 = vadd.f32 %v281_v44, %v1014_v42 }
 0x1ac   :  { %v222_v48 = vmul.f32 %v221_v46, %v221_v46  ;;  %v283_v49 = vmul.f32 %v282_v47, %v282_v47 }
 0x1ae   :  { %v228_v50 = vmul.f32 %v222_v48, %v965_v40  ;;  %v223_v38 = vmul.f32 %v222_v48, %v962_v39  ;;  %v289_v52 = vmul.f32 %v283_v49, %v965_v40  ;;  %v284_v53 = vmul.f32 %v283_v49, %v962_v39 }
 0x1af   :  { %v295_v56 = vmul.f32 %v283_v49, %v968_v41  ;;  %v234_v57 = vmul.f32 %v222_v48, %v968_v41  ;;  %v301_v60 = vmul.f32 %v283_v49, %v977_v45  ;;  %v240_v61 = vmul.f32 %v222_v48, %v977_v45 }
 0x1b0   :  { %v229_v37 = vsel %vm166_vm12, %v228_v50, 0.0  ;;  %v224_v51 = vsel %vm166_vm12, %v223_v38, 0.0  ;;  %v290_v54 = vsel %vm166_vm12, %v289_v52, 0.0  ;;  %v285_v55 = vsel %vm166_vm12, %v284_v53, 0.0 }
 0x1b1   :  { %230 = vadd.xlane.f32.xlu0 %v229_v37  ;;  %225 = vadd.xlane.f32.xlu1 %v224_v51  ;;  %v296_v58 = vsel %vm166_vm12, %v295_v56, 0.0  ;;  %v235_v59 = vsel %vm166_vm12, %v234_v57, 0.0  ;;  %v302_v62 = vsel %vm166_vm12, %v301_v60, 0.0  ;;  %v241_v63 = vsel %vm166_vm12, %v240_v61, 0.0 }
 0x1b5   :  { %291 = vadd.xlane.f32.xlu0 %v290_v54  ;;  %286 = vadd.xlane.f32.xlu1 %v285_v55 }
 0x1b9   :  { %297 = vadd.xlane.f32.xlu0 %v296_v58  ;;  %236 = vadd.xlane.f32.xlu1 %v235_v59 }
 0x1bd   :  { %303 = vadd.xlane.f32.xlu0 %v302_v62  ;;  %242 = vadd.xlane.f32.xlu1 %v241_v63 }
 0x23e   :  { %v231_v0 = vpop.xlane.xlu0 %230  ;;  %v226_v1 = vpop.xlane.xlu1 %225 }
 0x23f   :  { %v232_v5 = vmul.f32 %v231_v0, %v965_v40  ;;  %v227_v6 = vmul.f32 %v226_v1, %v962_v39 }
 0x241   :  { %v233_v15 = vadd.f32 %v232_v5, %v227_v6 }
 0x242   :  { %v292_v2 = vpop.xlane.xlu0 %291  ;;  %v287_v4 = vpop.xlane.xlu1 %286 }
 0x243   :  { %v293_v7 = vmul.f32 %v292_v2, %v965_v40  ;;  %v288_v8 = vmul.f32 %v287_v4, %v962_v39 }
 0x245   :  { %v294_v16 = vadd.f32 %v293_v7, %v288_v8 }
 0x246   :  { %v298_v9 = vpop.xlane.xlu0 %297  ;;  %v237_v10 = vpop.xlane.xlu1 %236 }
 0x247   :  { %v299_v11 = vmul.f32 %v298_v9, %v968_v41  ;;  %v238_v14 = vmul.f32 %v237_v10, %v968_v41 }
 0x249   :  { %v300_v21 = vadd.f32 %v299_v11, %v294_v16  ;;  %v239_v22 = vadd.f32 %v238_v14, %v233_v15 }
 0x24a   :  { %v304_v18 = vpop.xlane.xlu0 %303  ;;  %v243_v20 = vpop.xlane.xlu1 %242 }
 0x24b   :  { %v305_v23 = vmul.f32 %v304_v18, %v977_v45  ;;  %v244_v24 = vmul.f32 %v243_v20, %v977_v45 }
 0x24d   :  { %v306_v25 = vadd.f32 %v305_v23, %v300_v21  ;;  %v245_v26 = vadd.f32 %v244_v24, %v239_v22 }
 0x24f   :  { %v307_v27 = vadd.f32 1.0, %v306_v25  ;;  %v246_v29 = vadd.f32 1.0, %v245_v26 }
 0x251   :  { %836 = vrcp.f32 %v307_v27 }
 0x252   :  { %838 = vrcp.f32 %v246_v29 }
 0x253   :  { %840 = vrsqrt.f32 %v306_v25 }
 0x254   :  { %842 = vrsqrt.f32 %v245_v26 }
 0x25b   :  { %v837_v30 = vpop.eup %836 }
 0x25c   :  { %v839_v31 = vpop.eup %838  ;;  %v309_v33 = vmul.f32 %v837_v30, %v306_v25 }
 0x25d   :  { %v248_v34 = vmul.f32 %v839_v31, %v245_v26  ;;  %v841_v36 = vpop.eup %840 }
 0x25e   :  { %v310_v35 = vmul.f32 %v309_v33, %v282_v47  ;;  %v843_v44 = vpop.eup %842 }
 0x25f   :  { %v249_v43 = vmul.f32 %v248_v34, %v221_v46 }
 0x260   :  { %v312_v48 = vmul.f32 %v841_v36, %v310_v35 }
 0x261   :  { %v251_v49 = vmul.f32 %v843_v44, %v249_v43 }
 0x262   :  { %v316_v50 = vrot.slane %v312_v48, %v929_v12 }
 0x263   :  { %v255_v38 = vrot.slane %v251_v49, %v929_v12 }
 0x264   :  { %v317_v51 = vmul.f32 %v316_v50, %v938_v17 }
 0x265   :  { %v256_v37 = vmul.f32 %v255_v38, %v940_v19 }
 0x266   :  { %v323_v46 = vmul.f32 %v317_v51, %v965_v40  ;;  %v318_v55 = vmul.f32 %v317_v51, %v962_v39  ;;  %v329_v58 = vmul.f32 %v317_v51, %v968_v41  ;;  %v335_v62 = vmul.f32 %v317_v51, %v977_v45 }
 0x267   :  { %v262_v52 = vmul.f32 %v256_v37, %v965_v40  ;;  %v257_v53 = vmul.f32 %v256_v37, %v962_v39  ;;  %v268_v59 = vmul.f32 %v256_v37, %v968_v41  ;;  %v274_v63 = vmul.f32 %v256_v37, %v977_v45 }
 0x268   :  { %v324_v56 = vsel %vm135_vm1, %v323_v46, 0.0  ;;  %v319_v57 = vsel %vm135_vm1, %v318_v55, 0.0  ;;  %v330_v60 = vsel %vm135_vm1, %v329_v58, 0.0  ;;  %v336_v0 = vsel %vm135_vm1, %v335_v62, 0.0 }
 0x269   :  { %v263_v54 = vsel %vm135_vm1, %v262_v52, 0.0  ;;  %v258_v47 = vsel %vm135_vm1, %v257_v53, 0.0  ;;  %v269_v61 = vsel %vm135_vm1, %v268_v59, 0.0  ;;  %v275_v1 = vsel %vm135_vm1, %v274_v63, 0.0 }
 0x26a   :  { %264 = vadd.xlane.f32.xlu0 %v263_v54  ;;  %259 = vadd.xlane.f32.xlu1 %v258_v47 }
 0x26e   :  { %325 = vadd.xlane.f32.xlu0 %v324_v56  ;;  %320 = vadd.xlane.f32.xlu1 %v319_v57 }
 0x272   :  { %331 = vadd.xlane.f32.xlu0 %v330_v60  ;;  %270 = vadd.xlane.f32.xlu1 %v269_v61 }
 0x276   :  { %337 = vadd.xlane.f32.xlu0 %v336_v0  ;;  %276 = vadd.xlane.f32.xlu1 %v275_v1 }
 0x2f7   :  { %v265_v2 = vpop.xlane.xlu0 %264  ;;  %v260_v4 = vpop.xlane.xlu1 %259 }
 0x2f8   :  { %v266_v7 = vmul.f32 %v265_v2, %v965_v40  ;;  %v261_v8 = vmul.f32 %v260_v4, %v962_v39 }
 0x2fa   :  { %v267_v18 = vadd.f32 %v266_v7, %v261_v8 }
 0x2fb   :  { %v326_v5 = vpop.xlane.xlu0 %325  ;;  %v321_v6 = vpop.xlane.xlu1 %320 }
 0x2fc   :  { %v327_v9 = vmul.f32 %v326_v5, %v965_v40  ;;  %v322_v10 = vmul.f32 %v321_v6, %v962_v39 }
 0x2fe   :  { %v328_v20 = vadd.f32 %v327_v9, %v322_v10 }
 0x2ff   :  { %v332_v11 = vpop.xlane.xlu0 %331  ;;  %v271_v14 = vpop.xlane.xlu1 %270 }
 0x300   :  { %v333_v15 = vmul.f32 %v332_v11, %v968_v41  ;;  %v272_v16 = vmul.f32 %v271_v14, %v968_v41 }
 0x302   :  { %v334_v23 = vadd.f32 %v333_v15, %v328_v20  ;;  %v273_v24 = vadd.f32 %v272_v16, %v267_v18 }
 0x303   :  { %v338_v21 = vpop.xlane.xlu0 %337  ;;  %v277_v22 = vpop.xlane.xlu1 %276 }
 0x304   :  { %v339_v25 = vmul.f32 %v338_v21, %v977_v45  ;;  %v278_v26 = vmul.f32 %v277_v22, %v977_v45 }
 0x306   :  { %v340_v27 = vadd.f32 %v339_v25, %v334_v23  ;;  %v279_v29 = vadd.f32 %v278_v26, %v273_v24 }
 0x308   :  { %v367_v30 = vsel %vm135_vm1, %v340_v27, -inf  ;;  %v341_v31 = vsel %vm135_vm1, %v279_v29, -inf }
 0x309   :  { %368 = vmax.xlane.f32.xlu0 %v367_v30  ;;  %342 = vmax.xlane.f32.xlu1 %v341_v31 }
 0x396   :  { %v369_v33 = vpop.xlane.xlu0 %368  ;;  %v343_v34 = vpop.xlane.xlu1 %342 }
 0x397   :  { %v370_v35 = vmax.f32 %v369_v33, 0.0  ;;  %v344_v36 = vmax.f32 %v343_v34, 0.0 }
 0x399   :  { %v371_v43 = vsub.f32 %v340_v27, %v370_v35  ;;  %v345_v44 = vsub.f32 %v279_v29, %v344_v36  ;;  %v378_v52 = vsub.f32 0.0, %v370_v35  ;;  %v352_v53 = vsub.f32 0.0, %v344_v36 }
 0x39b   :  { %v372_v48 = vmul.f32 1.442695, %v371_v43  ;;  %v346_v49 = vmul.f32 1.442695, %v345_v44  ;;  %v379_v54 = vmul.f32 1.442695, %v378_v52 }
 0x39c   :  { %v353_v47 = vmul.f32 1.442695, %v352_v53 }
 0x39d   :  { %844 = vpow2.f32 %v372_v48 }
 0x39e   :  { %846 = vpow2.f32 %v346_v49 }
 0x39f   :  { %848 = vpow2.f32 %v379_v54 }
 0x3a0   :  { %850 = vpow2.f32 %v353_v47 }
 0x3a7   :  { %v845_v50 = vpop.eup %844 }
 0x3a8   :  { %v374_v38 = vsel %vm135_vm1, %v845_v50, 0.0  ;;  %v847_v37 = vpop.eup %846 }
 0x3a9   :  { %375 = vadd.xlane.f32.xlu0 %v374_v38  ;;  %v348_v51 = vsel %vm135_vm1, %v847_v37, 0.0  ;;  %v849_v56 = vpop.eup %848 }
 0x3aa   :  { %349 = vadd.xlane.f32.xlu1 %v348_v51  ;;  %v851_v60 = vpop.eup %850 }
 0x436   :  { %v376_v46 = vpop.xlane.xlu0 %375 }
 0x437   :  { %v377_v55 = vmul.f32 0.125, %v376_v46  ;;  %v350_v57 = vpop.xlane.xlu1 %349 }
 0x438   :  { %v351_v59 = vmul.f32 0.125, %v350_v57 }
 0x439   :  { %v381_v58 = vadd.f32 %v849_v56, %v377_v55 }
 0x43a   :  { %v355_v61 = vadd.f32 %v851_v60, %v351_v59 }
 0x43b   :  { %852 = vrcp.f32 %v381_v58 }
 0x43c   :  { %854 = vrcp.f32 %v355_v61 }
 0x445   :  { %v853_v62 = vpop.eup %852 }
 0x446   :  { %v383_v63 = vmul.f32 %v853_v62, %v845_v50  ;;  %v855_v0 = vpop.eup %854 }
 0x447   :  { %v357_v2 = vmul.f32 %v855_v0, %v847_v37 }
 0x448   :  { %v384_v1 = vmul.f32 %v383_v63, %v938_v17 }
 0x449   :  { %v358_v5 = vmul.f32 %v357_v2, %v940_v19 }
 0x44a   :  { %v385_v4 = vsel %vm135_vm1, %v384_v1, 0.0 }
 0x44b   :  { %v386_v6 = vrot.slane %v385_v4, 4  ;;  %v359_v7 = vsel %vm135_vm1, %v358_v5, 0.0 }
 0x44c   :  { %v360_v9 = vrot.slane %v359_v7, 4 }
 0x44d   :  { %v387_v8 = vadd.f32 %v386_v6, %v385_v4 }
 0x44e   :  { %v361_v10 = vadd.f32 %v360_v9, %v359_v7 }
 0x44f   :  { %v388_v11 = vrot.slane %v387_v8, 2 }
 0x450   :  { %v362_v14 = vrot.slane %v361_v10, 2 }
 0x451   :  { %v389_v15 = vadd.f32 %v388_v11, %v387_v8 }
 0x452   :  { %v363_v16 = vadd.f32 %v362_v14, %v361_v10 }
 0x453   :  { %v390_v18 = vrot.slane %v389_v15, 1 }
 0x454   :  { %v364_v20 = vrot.slane %v363_v16, 1 }
 0x455   :  { %v391_v21 = vadd.f32 %v390_v18, %v389_v15 }
 0x456   :  { %v365_v22 = vadd.f32 %v364_v20, %v363_v16 }
 0x457   :  { %v1079_v23 = vadd.f32 %v391_v21, %v934_v13 }
 0x458   :  { %v366_v24 = vadd.f32 %v365_v22, %v934_v13 }
 0x459   :  { %v395_v27 = vmul.f32 %v1079_v23, %v1079_v23 }
 0x45a   :  { %v394_v25 = vadd.f32 %v1079_v23, %v366_v24  ;;  %v393_v26 = vmul.f32 %v366_v24, %v366_v24 }
 0x45c   :  { %v402_v29 = vmul.f32 %v394_v25, %v965_v40  ;;  %v397_v30 = vmul.f32 %v394_v25, %v962_v39  ;;  %v414_v31 = vmul.f32 %v394_v25, %v977_v45  ;;  %v408_v35 = vmul.f32 %v394_v25, %v968_v41 }
 0x45d   :  { %v396_v36 = vadd.f32 %v395_v27, %v393_v26 }
 0x45e   :  { %v403_v33 = vsel %vm166_vm12, %v402_v29, 0.0  ;;  %v398_v34 = vsel %vm166_vm12, %v397_v30, 0.0  ;;  %v415_v13 = vsel %vm166_vm12, %v414_v31, 0.0  ;;  %v409_v43 = vsel %vm166_vm12, %v408_v35, 0.0 }
 0x45f   :  { %404 = vadd.xlane.f32.xlu0 %v403_v33  ;;  %399 = vadd.xlane.f32.xlu1 %v398_v34  ;;  %v426_v44 = vmul.f32 %v396_v36, %v965_v40  ;;  %v421_v48 = vmul.f32 %v396_v36, %v962_v39  ;;  %v432_v38 = vmul.f32 %v396_v36, %v968_v41 }
 0x460   :  { %v438_v37 = vmul.f32 %v396_v36, %v977_v45 }
 0x461   :  { %v427_v49 = vsel %vm166_vm12, %v426_v44, 0.0  ;;  %v422_v50 = vsel %vm166_vm12, %v421_v48, 0.0  ;;  %v433_v51 = vsel %vm166_vm12, %v432_v38, 0.0 }
 0x462   :  { %v439_v52 = vsel %vm166_vm12, %v438_v37, 0.0 }
 0x463   :  { %416 = vadd.xlane.f32.xlu0 %v415_v13  ;;  %410 = vadd.xlane.f32.xlu1 %v409_v43 }
 0x467   :  { %428 = vadd.xlane.f32.xlu1 %v427_v49  ;;  %423 = vadd.xlane.f32.xlu0 %v422_v50 }
 0x46b   :  { %434 = vadd.xlane.f32.xlu1 %v433_v51  ;;  %440 = vadd.xlane.f32.xlu0 %v439_v52 }
 0x4ec   :  { %v405_v53 = vpop.xlane.xlu0 %404  ;;  %v400_v54 = vpop.xlane.xlu1 %399 }
 0x4ed   :  { %v406_v47 = vmul.f32 %v405_v53, %v965_v40  ;;  %v401_v46 = vmul.f32 %v400_v54, %v962_v39 }
 0x4ef   :  { %v407_v57 = vadd.f32 %v406_v47, %v401_v46 }
 0x4f0   :  { %v417_v55 = vpop.xlane.xlu0 %416  ;;  %v411_v56 = vpop.xlane.xlu1 %410 }
 0x4f1   :  { %v412_v58 = vmul.f32 %v411_v56, %v968_v41  ;;  %v418_v62 = vmul.f32 %v417_v55, %v977_v45 }
 0x4f3   :  { %v413_v59 = vadd.f32 %v412_v58, %v407_v57 }
 0x4f4   :  { %v429_v60 = vpop.xlane.xlu1 %428  ;;  %v424_v61 = vpop.xlane.xlu0 %423 }
 0x4f5   :  { %v430_v63 = vmul.f32 %v429_v60, %v965_v40  ;;  %v425_v0 = vmul.f32 %v424_v61, %v962_v39  ;;  %v419_v1 = vadd.f32 %v418_v62, %v413_v59 }
 0x4f7   :  { %v431_v5 = vadd.f32 %v430_v63, %v425_v0  ;;  %v420_v7 = vmul.f32 0.0625, %v419_v1 }
 0x4f8   :  { %v435_v2 = vpop.xlane.xlu1 %434  ;;  %v441_v4 = vpop.xlane.xlu0 %440 }
 0x4f9   :  { %v436_v6 = vmul.f32 %v435_v2, %v968_v41  ;;  %v442_v9 = vmul.f32 %v441_v4, %v977_v45  ;;  %v445_v11 = vmul.f32 %v420_v7, %v420_v7  ;;  %v450_v20 = vsub.f32 %v366_v24, %v420_v7 }
 0x4fa   :  { %v511_v21 = vsub.f32 %v1079_v23, %v420_v7 }
 0x4fb   :  { %v437_v8 = vadd.f32 %v436_v6, %v431_v5 }
 0x4fd   :  { %v443_v10 = vadd.f32 %v442_v9, %v437_v8 }
 0x4ff   :  { %v444_v14 = vmul.f32 0.0625, %v443_v10 }
 0x501   :  { %v446_v15 = vsub.f32 %v444_v14, %v445_v11 }
 0x503   :  { %v447_v16 = vadd.f32 1e-05, %v446_v15 }
 0x505   :  { %856 = vrsqrt.f32 %v447_v16 }
 0x50f   :  { %v857_v18 = vpop.eup %856 }
 0x510   :  { %v449_v22 = vmul.f32 %v857_v18, %v1006_v32 }
 0x512   :  { %v451_v25 = vmul.f32 %v450_v20, %v449_v22  ;;  %v512_v26 = vmul.f32 %v511_v21, %v449_v22 }
 0x514   :  { %v452_v27 = vadd.f32 %v451_v25, %v1014_v42  ;;  %v513_v29 = vadd.f32 %v512_v26, %v1014_v42 }
 0x516   :  { %v453_v30 = vmul.f32 %v452_v27, %v452_v27  ;;  %v514_v31 = vmul.f32 %v513_v29, %v513_v29 }
 0x518   :  { %v459_v33 = vmul.f32 %v453_v30, %v965_v40  ;;  %v454_v34 = vmul.f32 %v453_v30, %v962_v39  ;;  %v520_v23 = vmul.f32 %v514_v31, %v965_v40  ;;  %v515_v36 = vmul.f32 %v514_v31, %v962_v39 }
 0x519   :  { %v526_v44 = vmul.f32 %v514_v31, %v968_v41  ;;  %v465_v48 = vmul.f32 %v453_v30, %v968_v41  ;;  %v532_v38 = vmul.f32 %v514_v31, %v977_v45  ;;  %v471_v37 = vmul.f32 %v453_v30, %v977_v45 }
 0x51a   :  { %v460_v35 = vsel %vm166_vm12, %v459_v33, 0.0  ;;  %v455_v24 = vsel %vm166_vm12, %v454_v34, 0.0  ;;  %v521_v13 = vsel %vm166_vm12, %v520_v23, 0.0  ;;  %v516_v43 = vsel %vm166_vm12, %v515_v36, 0.0 }
 0x51b   :  { %461 = vadd.xlane.f32.xlu0 %v460_v35  ;;  %456 = vadd.xlane.f32.xlu1 %v455_v24  ;;  %v527_v49 = vsel %vm166_vm12, %v526_v44, 0.0  ;;  %v466_v50 = vsel %vm166_vm12, %v465_v48, 0.0  ;;  %v533_v51 = vsel %vm166_vm12, %v532_v38, 0.0  ;;  %v472_v52 = vsel %vm166_vm12, %v471_v37, 0.0 }
 0x51f   :  { %522 = vadd.xlane.f32.xlu0 %v521_v13  ;;  %517 = vadd.xlane.f32.xlu1 %v516_v43 }
 0x523   :  { %528 = vadd.xlane.f32.xlu0 %v527_v49  ;;  %467 = vadd.xlane.f32.xlu1 %v466_v50 }
 0x527   :  { %534 = vadd.xlane.f32.xlu0 %v533_v51  ;;  %473 = vadd.xlane.f32.xlu1 %v472_v52 }
 0x5a8   :  { %v462_v53 = vpop.xlane.xlu0 %461  ;;  %v457_v54 = vpop.xlane.xlu1 %456 }
 0x5a9   :  { %v463_v55 = vmul.f32 %v462_v53, %v965_v40  ;;  %v458_v56 = vmul.f32 %v457_v54, %v962_v39 }
 0x5ab   :  { %v464_v63 = vadd.f32 %v463_v55, %v458_v56 }
 0x5ac   :  { %v523_v47 = vpop.xlane.xlu0 %522  ;;  %v518_v46 = vpop.xlane.xlu1 %517 }
 0x5ad   :  { %v524_v57 = vmul.f32 %v523_v47, %v965_v40  ;;  %v519_v58 = vmul.f32 %v518_v46, %v962_v39 }
 0x5af   :  { %v525_v0 = vadd.f32 %v524_v57, %v519_v58 }
 0x5b0   :  { %v529_v59 = vpop.xlane.xlu0 %528  ;;  %v468_v60 = vpop.xlane.xlu1 %467 }
 0x5b1   :  { %v530_v61 = vmul.f32 %v529_v59, %v968_v41  ;;  %v469_v62 = vmul.f32 %v468_v60, %v968_v41 }
 0x5b3   :  { %v531_v4 = vadd.f32 %v530_v61, %v525_v0  ;;  %v470_v5 = vadd.f32 %v469_v62, %v464_v63 }
 0x5b4   :  { %v535_v1 = vpop.xlane.xlu0 %534  ;;  %v474_v2 = vpop.xlane.xlu1 %473 }
 0x5b5   :  { %v536_v6 = vmul.f32 %v535_v1, %v977_v45  ;;  %v475_v7 = vmul.f32 %v474_v2, %v977_v45 }
 0x5b7   :  { %v537_v8 = vadd.f32 %v536_v6, %v531_v4  ;;  %v476_v9 = vadd.f32 %v475_v7, %v470_v5 }
 0x5b9   :  { %v538_v10 = vadd.f32 1.0, %v537_v8  ;;  %v477_v11 = vadd.f32 1.0, %v476_v9 }
 0x5bb   :  { %858 = vrcp.f32 %v538_v10 }
 0x5bc   :  { %860 = vrcp.f32 %v477_v11 }
 0x5bd   :  { %862 = vrsqrt.f32 %v537_v8 }
 0x5be   :  { %864 = vrsqrt.f32 %v476_v9 }
 0x5c5   :  { %v859_v14 = vpop.eup %858 }
 0x5c6   :  { %v861_v15 = vpop.eup %860  ;;  %v540_v16 = vmul.f32 %v859_v14, %v537_v8 }
 0x5c7   :  { %v479_v18 = vmul.f32 %v861_v15, %v476_v9  ;;  %v863_v21 = vpop.eup %862 }
 0x5c8   :  { %v541_v20 = vmul.f32 %v540_v16, %v513_v29  ;;  %v865_v25 = vpop.eup %864 }
 0x5c9   :  { %v480_v22 = vmul.f32 %v479_v18, %v452_v27 }
 0x5ca   :  { %v543_v26 = vmul.f32 %v863_v21, %v541_v20 }
 0x5cb   :  { %v482_v30 = vmul.f32 %v865_v25, %v480_v22 }
 0x5cc   :  { %v547_v31 = vrot.slane %v543_v26, %v929_v12 }
 0x5cd   :  { %v486_v33 = vrot.slane %v482_v30, %v929_v12 }
 0x5ce   :  { %v548_v35 = vmul.f32 %v547_v31, %v938_v17 }
 0x5cf   :  { %v487_v34 = vmul.f32 %v486_v33, %v940_v19 }
 0x5d0   :  { %v554_v27 = vmul.f32 %v548_v35, %v965_v40  ;;  %v549_v13 = vmul.f32 %v548_v35, %v962_v39  ;;  %v560_v44 = vmul.f32 %v548_v35, %v968_v41  ;;  %v566_v38 = vmul.f32 %v548_v35, %v977_v45 }
 0x5d1   :  { %v493_v24 = vmul.f32 %v487_v34, %v965_v40  ;;  %v488_v23 = vmul.f32 %v487_v34, %v962_v39  ;;  %v499_v48 = vmul.f32 %v487_v34, %v968_v41  ;;  %v505_v37 = vmul.f32 %v487_v34, %v977_v45 }
 0x5d2   :  { %v555_v12 = vsel %vm135_vm1, %v554_v27, 0.0  ;;  %v550_v43 = vsel %vm135_vm1, %v549_v13, 0.0  ;;  %v561_v49 = vsel %vm135_vm1, %v560_v44, 0.0  ;;  %v567_v51 = vsel %vm135_vm1, %v566_v38, 0.0 }
 0x5d3   :  { %v494_v36 = vsel %vm135_vm1, %v493_v24, 0.0  ;;  %v489_v29 = vsel %vm135_vm1, %v488_v23, 0.0  ;;  %v500_v50 = vsel %vm135_vm1, %v499_v48, 0.0  ;;  %v506_v52 = vsel %vm135_vm1, %v505_v37, 0.0 }
 0x5d4   :  { %495 = vadd.xlane.f32.xlu0 %v494_v36  ;;  %490 = vadd.xlane.f32.xlu1 %v489_v29 }
 0x5d8   :  { %556 = vadd.xlane.f32.xlu0 %v555_v12  ;;  %551 = vadd.xlane.f32.xlu1 %v550_v43 }
 0x5dc   :  { %562 = vadd.xlane.f32.xlu0 %v561_v49  ;;  %501 = vadd.xlane.f32.xlu1 %v500_v50 }
 0x5e0   :  { %568 = vadd.xlane.f32.xlu0 %v567_v51  ;;  %507 = vadd.xlane.f32.xlu1 %v506_v52 }
 0x661   :  { %v496_v53 = vpop.xlane.xlu0 %495  ;;  %v491_v54 = vpop.xlane.xlu1 %490 }
 0x662   :  { %v497_v55 = vmul.f32 %v496_v53, %v965_v40  ;;  %v492_v56 = vmul.f32 %v491_v54, %v962_v39 }
 0x664   :  { %v498_v63 = vadd.f32 %v497_v55, %v492_v56 }
 0x665   :  { %v557_v47 = vpop.xlane.xlu0 %556  ;;  %v552_v46 = vpop.xlane.xlu1 %551 }
 0x666   :  { %v558_v57 = vmul.f32 %v557_v47, %v965_v40  ;;  %v553_v58 = vmul.f32 %v552_v46, %v962_v39 }
 0x668   :  { %v559_v0 = vadd.f32 %v558_v57, %v553_v58 }
 0x669   :  { %v563_v59 = vpop.xlane.xlu0 %562  ;;  %v502_v60 = vpop.xlane.xlu1 %501 }
 0x66a   :  { %v564_v61 = vmul.f32 %v563_v59, %v968_v41  ;;  %v503_v62 = vmul.f32 %v502_v60, %v968_v41 }
 0x66c   :  { %v565_v4 = vadd.f32 %v564_v61, %v559_v0  ;;  %v504_v5 = vadd.f32 %v503_v62, %v498_v63 }
 0x66d   :  { %v569_v1 = vpop.xlane.xlu0 %568  ;;  %v508_v2 = vpop.xlane.xlu1 %507 }
 0x66e   :  { %v570_v6 = vmul.f32 %v569_v1, %v977_v45  ;;  %v509_v7 = vmul.f32 %v508_v2, %v977_v45 }
 0x670   :  { %v571_v8 = vadd.f32 %v570_v6, %v565_v4  ;;  %v510_v9 = vadd.f32 %v509_v7, %v504_v5 }
 0x672   :  { %v598_v10 = vsel %vm135_vm1, %v571_v8, -inf  ;;  %v572_v11 = vsel %vm135_vm1, %v510_v9, -inf }
 0x673   :  { %599 = vmax.xlane.f32.xlu0 %v598_v10  ;;  %573 = vmax.xlane.f32.xlu1 %v572_v11 }
 0x700   :  { %v600_v14 = vpop.xlane.xlu0 %599  ;;  %v574_v15 = vpop.xlane.xlu1 %573 }
 0x701   :  { %v601_v16 = vmax.f32 %v600_v14, 0.0  ;;  %v575_v18 = vmax.f32 %v574_v15, 0.0 }
 0x703   :  { %v602_v20 = vsub.f32 %v571_v8, %v601_v16  ;;  %v576_v21 = vsub.f32 %v510_v9, %v575_v18  ;;  %v609_v34 = vsub.f32 0.0, %v601_v16  ;;  %v583_v35 = vsub.f32 0.0, %v575_v18 }
 0x705   :  { %v603_v22 = vmul.f32 1.442695, %v602_v20  ;;  %v577_v25 = vmul.f32 1.442695, %v576_v21  ;;  %v610_v24 = vmul.f32 1.442695, %v609_v34 }
 0x706   :  { %v584_v23 = vmul.f32 1.442695, %v583_v35 }
 0x707   :  { %866 = vpow2.f32 %v603_v22 }
 0x708   :  { %868 = vpow2.f32 %v577_v25 }
 0x709   :  { %870 = vpow2.f32 %v610_v24 }
 0x70a   :  { %872 = vpow2.f32 %v584_v23 }
 0x711   :  { %v867_v26 = vpop.eup %866 }
 0x712   :  { %v605_v30 = vsel %vm135_vm1, %v867_v26, 0.0  ;;  %v869_v31 = vpop.eup %868 }
 0x713   :  { %606 = vadd.xlane.f32.xlu0 %v605_v30  ;;  %v579_v33 = vsel %vm135_vm1, %v869_v31, 0.0  ;;  %v871_v27 = vpop.eup %870 }
 0x714   :  { %580 = vadd.xlane.f32.xlu1 %v579_v33  ;;  %v873_v44 = vpop.eup %872 }
 0x7a0   :  { %v607_v36 = vpop.xlane.xlu0 %606 }
 0x7a1   :  { %v608_v29 = vmul.f32 0.125, %v607_v36  ;;  %v581_v13 = vpop.xlane.xlu1 %580 }
 0x7a2   :  { %v582_v43 = vmul.f32 0.125, %v581_v13 }
 0x7a3   :  { %v612_v12 = vadd.f32 %v871_v27, %v608_v29 }
 0x7a4   :  { %v586_v48 = vadd.f32 %v873_v44, %v582_v43 }
 0x7a5   :  { %874 = vrcp.f32 %v612_v12 }
 0x7a6   :  { %876 = vrcp.f32 %v586_v48 }
 0x7af   :  { %v875_v49 = vpop.eup %874 }
 0x7b0   :  { %v1169_v50 = vmul.f32 %v875_v49, %v867_v26  ;;  %v877_v38 = vpop.eup %876 }
 0x7b1   :  { %v1171_v37 = vmul.f32 %v877_v38, %v869_v31 }
 0x7b2   :  { %v615_v51 = vmul.f32 %v1169_v50, %v938_v17  ;;  %v888_v17 = vld [vmem:[%s1297_s2] sm:$0x1] }
 0x7b3   :  { %v589_v52 = vmul.f32 %v1171_v37, %v940_v19 }
 0x7b4   :  { %v616_v53 = vsel %vm135_vm1, %v615_v51, 0.0 }
 0x7b5   :  { %v617_v54 = vrot.slane %v616_v53, 4  ;;  %v590_v47 = vsel %vm135_vm1, %v589_v52, 0.0 }
 0x7b6   :  { %v591_v46 = vrot.slane %v590_v47, 4 }
 0x7b7   :  { %v618_v55 = vadd.f32 %v617_v54, %v616_v53 }
 0x7b8   :  { %v592_v56 = vadd.f32 %v591_v46, %v590_v47 }
 0x7b9   :  { %v619_v57 = vrot.slane %v618_v55, 2 }
 0x7ba   :  { %v593_v58 = vrot.slane %v592_v56, 2 }
 0x7bb   :  { %v620_v59 = vadd.f32 %v619_v57, %v618_v55 }
 0x7bc   :  { %v594_v60 = vadd.f32 %v593_v58, %v592_v56 }
 0x7bd   :  { %v621_v61 = vrot.slane %v620_v59, 1 }
 0x7be   :  { %v595_v62 = vrot.slane %v594_v60, 1 }
 0x7bf   :  { %v622_v63 = vadd.f32 %v621_v61, %v620_v59 }
 0x7c0   :  { %v596_v0 = vadd.f32 %v595_v62, %v594_v60 }
 0x7c1   :  { %v1182_v19 = vadd.f32 %v888_v17, %v622_v63 }
 0x7c2   :  { %v597_v1 = vadd.f32 %v888_v17, %v596_v0 }
 0x7c3   :  { %v626_v5 = vmul.f32 %v1182_v19, %v1182_v19 }
 0x7c4   :  { %v625_v2 = vadd.f32 %v1182_v19, %v597_v1  ;;  %v624_v4 = vmul.f32 %v597_v1, %v597_v1 }
 0x7c6   :  { %v633_v6 = vmul.f32 %v625_v2, %v965_v40  ;;  %v628_v7 = vmul.f32 %v625_v2, %v962_v39  ;;  %v645_v8 = vmul.f32 %v625_v2, %v977_v45  ;;  %v639_v11 = vmul.f32 %v625_v2, %v968_v41 }
 0x7c7   :  { %v627_v14 = vadd.f32 %v626_v5, %v624_v4 }
 0x7c8   :  { %v634_v9 = vsel %vm166_vm12, %v633_v6, 0.0  ;;  %v629_v10 = vsel %vm166_vm12, %v628_v7, 0.0  ;;  %v646_v15 = vsel %vm166_vm12, %v645_v8, 0.0  ;;  %v640_v16 = vsel %vm166_vm12, %v639_v11, 0.0 }
 0x7c9   :  { %635 = vadd.xlane.f32.xlu0 %v634_v9  ;;  %630 = vadd.xlane.f32.xlu1 %v629_v10  ;;  %v657_v18 = vmul.f32 %v627_v14, %v965_v40  ;;  %v652_v20 = vmul.f32 %v627_v14, %v962_v39  ;;  %v663_v25 = vmul.f32 %v627_v14, %v968_v41 }
 0x7ca   :  { %v669_v26 = vmul.f32 %v627_v14, %v977_v45 }
 0x7cb   :  { %v658_v21 = vsel %vm166_vm12, %v657_v18, 0.0  ;;  %v653_v22 = vsel %vm166_vm12, %v652_v20, 0.0  ;;  %v664_v30 = vsel %vm166_vm12, %v663_v25, 0.0 }
 0x7cc   :  { %v670_v31 = vsel %vm166_vm12, %v669_v26, 0.0  ;;  %v754_v26 = vmul.f32 %v1171_v37, %v965_v40 }
 0x7cd   :  { %647 = vadd.xlane.f32.xlu0 %v646_v15  ;;  %641 = vadd.xlane.f32.xlu1 %v640_v16 }
 0x7d1   :  { %659 = vadd.xlane.f32.xlu1 %v658_v21  ;;  %654 = vadd.xlane.f32.xlu0 %v653_v22 }
 0x7d5   :  { %665 = vadd.xlane.f32.xlu1 %v664_v30  ;;  %671 = vadd.xlane.f32.xlu0 %v670_v31  ;;  %v748_v30 = vmul.f32 %v1171_v37, %v962_v39  ;;  %v755_v31 = vsel %vm135_vm1, %v754_v26, 0.0 }
 0x856   :  { %v636_v33 = vpop.xlane.xlu0 %635  ;;  %v631_v34 = vpop.xlane.xlu1 %630 }
 0x857   :  { %v637_v35 = vmul.f32 %v636_v33, %v965_v40  ;;  %v632_v24 = vmul.f32 %v631_v34, %v962_v39  ;;  %v749_v33 = vsel %vm135_vm1, %v748_v30, 0.0  ;;  %v784_v34 = vmul.f32 %v1169_v50, %v965_v40 }
 0x859   :  { %v638_v29 = vadd.f32 %v637_v35, %v632_v24  ;;  %v778_v35 = vmul.f32 %v1169_v50, %v962_v39  ;;  %v785_v24 = vsel %vm135_vm1, %v784_v34, 0.0 }
 0x85a   :  { %v648_v23 = vpop.xlane.xlu0 %647  ;;  %v642_v36 = vpop.xlane.xlu1 %641 }
 0x85b   :  { %v643_v27 = vmul.f32 %v642_v36, %v968_v41  ;;  %v649_v44 = vmul.f32 %v648_v23, %v977_v45  ;;  %v779_v23 = vsel %vm135_vm1, %v778_v35, 0.0  ;;  %v791_v36 = vmul.f32 %v1169_v50, %v968_v41 }
 0x85d   :  { %v644_v13 = vadd.f32 %v643_v27, %v638_v29  ;;  %v761_v29 = vmul.f32 %v1171_v37, %v968_v41  ;;  %v792_v27 = vsel %vm135_vm1, %v791_v36, 0.0 }
 0x85e   :  { %v660_v12 = vpop.xlane.xlu1 %659  ;;  %v655_v43 = vpop.xlane.xlu0 %654 }
 0x85f   :  { %v661_v48 = vmul.f32 %v660_v12, %v965_v40  ;;  %v656_v49 = vmul.f32 %v655_v43, %v962_v39  ;;  %v650_v38 = vadd.f32 %v649_v44, %v644_v13  ;;  %v762_v13 = vsel %vm135_vm1, %v761_v29, 0.0 }
 0x860   :  { %v798_v12 = vmul.f32 %v1169_v50, %v977_v45  ;;  %v768_v43 = vmul.f32 %v1171_v37, %v977_v45 }
 0x861   :  { %v662_v53 = vadd.f32 %v661_v48, %v656_v49  ;;  %v651_v47 = vmul.f32 0.0625, %v650_v38 }
 0x862   :  { %v666_v51 = vpop.xlane.xlu1 %665  ;;  %v672_v52 = vpop.xlane.xlu0 %671  ;;  %v799_v44 = vsel %vm135_vm1, %v798_v12, 0.0  ;;  %v769_v48 = vsel %vm135_vm1, %v768_v43, 0.0  ;;  %vm775_vm1 = vcmask 31744  }
 0x863   :  { %v667_v54 = vmul.f32 %v666_v51, %v968_v41  ;;  %v673_v55 = vmul.f32 %v672_v52, %v977_v45  ;;  %v676_v57 = vmul.f32 %v651_v47, %v651_v47  ;;  %v681_v62 = vsub.f32 %v597_v1, %v651_v47 }
 0x864   :  { %v714_v63 = vsub.f32 %v1182_v19, %v651_v47 }
 0x865   :  { %v668_v46 = vadd.f32 %v667_v54, %v662_v53 }
 0x867   :  { %v674_v56 = vadd.f32 %v673_v55, %v668_v46 }
 0x869   :  { %v675_v58 = vmul.f32 0.0625, %v674_v56 }
 0x86b   :  { %v677_v59 = vsub.f32 %v675_v58, %v676_v57 }
 0x86d   :  { %v678_v60 = vadd.f32 1e-05, %v677_v59 }
 0x86f   :  { %878 = vrsqrt.f32 %v678_v60 }
 0x879   :  { %v879_v61 = vpop.eup %878 }
 0x87a   :  { %v680_v0 = vmul.f32 %v879_v61, %v1006_v32 }
 0x87c   :  { %v682_v17 = vmul.f32 %v681_v62, %v680_v0  ;;  %v715_v2 = vmul.f32 %v714_v63, %v680_v0 }
 0x87e   :  { %v1214_v4 = vadd.f32 %v682_v17, %v1014_v42  ;;  %v1217_v5 = vadd.f32 %v715_v2, %v1014_v42 }
 0x880   :  { %v684_v6 = vmul.f32 %v1214_v4, %v1214_v4  ;;  %v717_v7 = vmul.f32 %v1217_v5, %v1217_v5 }
 0x882   :  { %v690_v1 = vmul.f32 %v684_v6, %v965_v40  ;;  %v685_v19 = vmul.f32 %v684_v6, %v962_v39  ;;  %v723_v9 = vmul.f32 %v717_v7, %v965_v40  ;;  %v718_v10 = vmul.f32 %v717_v7, %v962_v39 }
 0x883   :  { %v729_v14 = vmul.f32 %v717_v7, %v968_v41  ;;  %v696_v15 = vmul.f32 %v684_v6, %v968_v41  ;;  %v735_v20 = vmul.f32 %v717_v7, %v977_v45  ;;  %v702_v21 = vmul.f32 %v684_v6, %v977_v45 }
 0x884   :  { %v691_v32 = vsel %vm166_vm12, %v690_v1, 0.0  ;;  %v686_v8 = vsel %vm166_vm12, %v685_v19, 0.0  ;;  %v724_v42 = vsel %vm166_vm12, %v723_v9, 0.0  ;;  %v719_v11 = vsel %vm166_vm12, %v718_v10, 0.0 }
 0x885   :  { %692 = vadd.xlane.f32.xlu0 %v691_v32  ;;  %687 = vadd.xlane.f32.xlu1 %v686_v8  ;;  %v730_v16 = vsel %vm166_vm12, %v729_v14, 0.0  ;;  %v697_v18 = vsel %vm166_vm12, %v696_v15, 0.0  ;;  %v736_v22 = vsel %vm166_vm12, %v735_v20, 0.0  ;;  %v703_v25 = vsel %vm166_vm12, %v702_v21, 0.0 }
 0x886   :  { %v130_v9 = vsel %vm129_vm13, 1.0, %v889_v3  ;;  %v128_v10 = vsel %vm127_vm14, 1.0, %v889_v3 }
 0x889   :  { %725 = vadd.xlane.f32.xlu0 %v724_v42  ;;  %720 = vadd.xlane.f32.xlu1 %v719_v11  ;;  %v132_v42 = vsel %vm131_vm15, 1.0, %v889_v3 }
 0x88d   :  { %731 = vadd.xlane.f32.xlu0 %v730_v16  ;;  %698 = vadd.xlane.f32.xlu1 %v697_v18 }
 0x891   :  { %737 = vadd.xlane.f32.xlu0 %v736_v22  ;;  %704 = vadd.xlane.f32.xlu1 %v703_v25 }
 0x895   :  { %756 = vadd.xlane.f32.xlu0 %v755_v31  ;;  %750 = vadd.xlane.f32.xlu1 %v749_v33  ;;  %v134_v31 = vsel %vm133_vm0, 1.0, %v889_v3 }
 0x899   :  { %786 = vadd.xlane.f32.xlu0 %v785_v24  ;;  %780 = vadd.xlane.f32.xlu1 %v779_v23 }
 0x89d   :  { %793 = vadd.xlane.f32.xlu0 %v792_v27  ;;  %763 = vadd.xlane.f32.xlu1 %v762_v13 }
 0x8a1   :  { %800 = vadd.xlane.f32.xlu0 %v799_v44  ;;  %770 = vadd.xlane.f32.xlu1 %v769_v48 }
 0x912   :  { %v693_v49 = vpop.xlane.xlu0 %692  ;;  %v688_v38 = vpop.xlane.xlu1 %687 }
 0x913   :  { %v694_v53 = vmul.f32 %v693_v49, %v965_v40  ;;  %v689_v54 = vmul.f32 %v688_v38, %v962_v39 }
 0x915   :  { %v695_v57 = vadd.f32 %v694_v53, %v689_v54 }
 0x916   :  { %v726_v51 = vpop.xlane.xlu0 %725  ;;  %v721_v52 = vpop.xlane.xlu1 %720 }
 0x917   :  { %v727_v50 = vmul.f32 %v726_v51, %v965_v40  ;;  %v722_v37 = vmul.f32 %v721_v52, %v962_v39 }
 0x919   :  { %v728_v58 = vadd.f32 %v727_v50, %v722_v37 }
 0x91a   :  { %v732_v47 = vpop.xlane.xlu0 %731  ;;  %v699_v46 = vpop.xlane.xlu1 %698 }
 0x91b   :  { %v733_v55 = vmul.f32 %v732_v47, %v968_v41  ;;  %v700_v56 = vmul.f32 %v699_v46, %v968_v41 }
 0x91d   :  { %v734_v61 = vadd.f32 %v733_v55, %v728_v58  ;;  %v701_v62 = vadd.f32 %v700_v56, %v695_v57 }
 0x91e   :  { %v738_v59 = vpop.xlane.xlu0 %737  ;;  %v705_v60 = vpop.xlane.xlu1 %704 }
 0x91f   :  { %v739_v63 = vmul.f32 %v738_v59, %v977_v45  ;;  %v706_v0 = vmul.f32 %v705_v60, %v977_v45 }
 0x921   :  { %v740_v17 = vadd.f32 %v739_v63, %v734_v61  ;;  %v707_v40 = vadd.f32 %v706_v0, %v701_v62 }
 0x922   :  { %v757_v2 = vpop.xlane.xlu0 %756  ;;  %v751_v39 = vpop.xlane.xlu1 %750 }
 0x923   :  { %v741_v6 = vadd.f32 1.0, %v740_v17  ;;  %v708_v7 = vadd.f32 1.0, %v707_v40  ;;  %v758_v19 = vmul.f32 0.125, %v757_v2  ;;  %v752_v32 = vmul.f32 0.125, %v751_v39 }
 0x925   :  { %880 = vrcp.f32 %v741_v6  ;;  %v759_v18 = vmul.f32 %v758_v19, %v130_v9  ;;  %v753_v20 = vmul.f32 %v752_v32, %v128_v10 }
 0x926   :  { %882 = vrcp.f32 %v708_v7  ;;  %v787_v41 = vpop.xlane.xlu0 %786  ;;  %v781_v1 = vpop.xlane.xlu1 %780 }
 0x927   :  { %v788_v8 = vmul.f32 0.125, %v787_v41  ;;  %v782_v45 = vmul.f32 0.125, %v781_v1  ;;  %884 = vrsqrt.f32 %v740_v17  ;;  %v760_v24 = vadd.f32 %v759_v18, %v753_v20 }
 0x928   :  { %886 = vrsqrt.f32 %v707_v40 }
 0x929   :  { %v789_v11 = vmul.f32 %v788_v8, %v130_v9  ;;  %v783_v14 = vmul.f32 %v782_v45, %v128_v10 }
 0x92a   :  { %v794_v15 = vpop.xlane.xlu0 %793  ;;  %v764_v16 = vpop.xlane.xlu1 %763 }
 0x92b   :  { %v795_v21 = vmul.f32 0.125, %v794_v15  ;;  %v765_v22 = vmul.f32 0.125, %v764_v16  ;;  %v790_v30 = vadd.f32 %v789_v11, %v783_v14 }
 0x92d   :  { %v796_v25 = vmul.f32 %v795_v21, %v132_v42  ;;  %v766_v26 = vmul.f32 %v765_v22, %v132_v42 }
 0x92e   :  { %v801_v33 = vpop.xlane.xlu0 %800  ;;  %v771_v34 = vpop.xlane.xlu1 %770 }
 0x92f   :  { %v881_v35 = vpop.eup %880  ;;  %v802_v23 = vmul.f32 0.125, %v801_v33  ;;  %v772_v36 = vmul.f32 0.125, %v771_v34  ;;  %v797_v13 = vadd.f32 %v796_v25, %v790_v30  ;;  %v767_v28 = vadd.f32 %v766_v26, %v760_v24 }
 0x930   :  { %v883_v29 = vpop.eup %882  ;;  %v743_v27 = vmul.f32 %v881_v35, %v740_v17 }
 0x931   :  { %v710_v12 = vmul.f32 %v883_v29, %v707_v40  ;;  %v803_v43 = vmul.f32 %v802_v23, %v134_v31  ;;  %v773_v44 = vmul.f32 %v772_v36, %v134_v31  ;;  %v885_v49 = vpop.eup %884 }
 0x932   :  { %v744_v48 = vmul.f32 %v743_v27, %v1217_v5  ;;  %v887_v52 = vpop.eup %886 }
 0x933   :  { %v711_v38 = vmul.f32 %v710_v12, %v1214_v4  ;;  %v804_v3 = vadd.f32 %v803_v43, %v797_v13  ;;  %v774_v51 = vadd.f32 %v773_v44, %v767_v28 }
 0x934   :  { %v746_v53 = vmul.f32 %v885_v49, %v744_v48 }
 0x935   :  { %v713_v54 = vmul.f32 %v887_v52, %v711_v38  ;;  %805 = vst.msk [vmem:[%s1298_s4 + $0x8] sm:$0xff] %vm775_vm1, %v804_v3  ;;  %776 = vst.msk [vmem:[%s1298_s4] sm:$0xff] %vm775_vm1, %v774_v51 }
 0x936   :  { %777 = vst.msk [vmem:[%s1299_s3 + $0x1] sm:$0x1] %vm166_vm12, %v746_v53 }
 0x937   :  { %747 = vst.msk [vmem:[%s1299_s3] sm:$0x1] %vm166_vm12, %v713_v54 }

</bundles_post_ra>
